<compile_context>
chip_gen: v7x
topology: tpu7x:2x2x1
jax: 0.10.0
libtpu: 0.0.40
codegen_flags: <defaults>
</compile_context>

<pallas_src>
import functools
import math

import jax
import jax.numpy as jnp
import numpy as np
from jax.experimental import pallas as pl
from jax.experimental.pallas import tpu as pltpu

_LANES = 128
_SUBLANES = 8
_MAX_ROW_STEP = 256     # upper bound on the row-tile alignment step


def _round_up(x, m):
    return -(-x // m) * m


def _conv_relu_kernel(x_ref, w_ref, b_ref, o_ref, a_ref, *, KH, KW, TH, Wo):
    """One (batch, output-row-tile) grid step.

    x_ref : (Hpp, Wp, Cin)   padded input image, VMEM-resident across the
                             inner row-tile axis (index_map ignores t)
    w_ref : (Kpad, Cpad)     lane-dense weight slab (zero rows past K)
    b_ref : (1, Cpad)        f32 bias, zero-padded lanes
    o_ref : (TH*Wo, Cout)    output block (true Cout, no lane padding in HBM)
    a_ref : (TH*Wo, Kpad)    VMEM scratch: im2col staging buffer
    """
    Cin = x_ref.shape[-1]
    K = KH * KW * Cin
    Kpad = a_ref.shape[-1]
    M = a_ref.shape[0]

    t = pl.program_id(1)
    h0 = pl.multiple_of(t * TH, TH)              # first output row of the tile
    # Halo'd row slab: output rows [h0, h0+TH) read padded rows
    # [h0, h0 + TH + KH - 1).
    slab = x_ref[pl.ds(h0, TH + KH - 1), :, :]   # (TH+KH-1, Wp, Cin)

    # In-kernel im2col into a VMEM scratch at static lane offsets: one store
    # per tap instead of a lane-rotate/select chain from jnp.concatenate.
    # (Offsets are multiples of Cin, so for Cin % 128 != 0 the stores are
    # still lane-masked; the contraction itself is fully lane-dense.)
    for kh in range(KH):
        for kw in range(KW):
            tap = slab[kh:kh + TH, kw:kw + Wo, :]        # (TH, Wo, Cin)
            off = (kh * KW + kw) * Cin
            a_ref[:, off:off + Cin] = tap.reshape(M, Cin)
    if Kpad > K:
        # Zero the tail columns so the (zero) weight rows only ever multiply
        # zeros, never uninitialized VMEM.  Unconditional on purpose: with
        # megacore grid sharding a core may never execute grid step (0, 0).
        a_ref[:, K:] = jnp.zeros((M, Kpad - K), dtype=a_ref.dtype)

    # Single big-K MXU matmul, f32 accumulation, fused bias + ReLU epilogue.
    acc = jnp.dot(a_ref[...], w_ref[...], preferred_element_type=jnp.float32)
    acc = acc + b_ref[...].astype(jnp.float32)
    acc = jnp.maximum(acc, 0.0)
    o_ref[...] = acc[:, :o_ref.shape[-1]].astype(o_ref.dtype)


def _vmem_limit_bytes():
    """Generation-aware VMEM budget (~48 MiB on 64 MiB parts, ~96 MiB on 128)."""
    cap = None
    try:
        cap = getattr(pltpu.get_tpu_info(), "vmem_capacity_bytes", None)
    except Exception:
        cap = None
    if not cap:
        cap = 64 * 1024 * 1024               # conservative: v7x per-core VMEM
    return int(min(cap - cap // 4, 100 * 1024 * 1024))


def _pick_row_tile(Ho, Wo, *, target_rows, max_rows):
    """Output rows per grid step (TH).

    TH*Wo (the GEMM M dim) is kept a multiple of 256 when affordable (fills
    the 256-wide MXU on v6e/v7x), else a multiple of 8 (sublane rule).  Ho
    need not divide by TH: the wrapper pads/strips trailing rows, so there is
    no "whole image in one grid step" fallback cliff.
    """
    target_rows = max(_SUBLANES, min(target_rows, max_rows))
    for quantum in (256, _SUBLANES):
        step = quantum // math.gcd(Wo, quantum)   # min TH with TH*Wo % quantum == 0
        if quantum != _SUBLANES and step * Wo > max_rows:
            continue                              # 256-alignment would blow the budget
        th = step * max(1, target_rows // (step * Wo))
        return min(th, _round_up(Ho, step))       # never beyond one (padded) image
    raise AssertionError("unreachable")


@functools.partial(jax.jit, static_argnames=("padding", "compute_dtype"))
def basic_conv2d(x_nchw, weight_oihw, bias, *, padding=1,
                 compute_dtype=jnp.bfloat16):
    """Conv2d(stride=1, padding=padding) + ReLU with PyTorch NCHW semantics."""
    # TODO(synk): stride != 1, dilation and grouped conv are not implemented.
    N, Cin, H, W = x_nchw.shape
    Cout, Cin_w, KH, KW = weight_oihw.shape
    assert Cin == Cin_w

    out_dtype = x_nchw.dtype
    Hp, Wp = H + 2 * padding, W + 2 * padding
    Ho, Wo = Hp - KH + 1, Wp - KW + 1
    K = KH * KW * Cin
    Kpad = _round_up(K, _LANES)                  # lane-dense contraction axis
    Cpad = _round_up(Cout, _LANES)               # lane-dense GEMM N axis

    cbytes = jnp.dtype(compute_dtype).itemsize
    obytes = jnp.dtype(out_dtype).itemsize

    # --- VMEM budget -> row tile --------------------------------------------
    vmem_limit = _vmem_limit_bytes()
    fixed_bytes = (2 * (Hp + _MAX_ROW_STEP) * Wp * Cin * cbytes  # image block x2
                   + 2 * Kpad * Cpad * cbytes                    # weight slab x2
                   + 2 * Cpad * 4                                # bias x2
                   + (4 << 20))                                  # Mosaic slack
    per_row_bytes = (2 * Cout * obytes         # output block x2
                     + Kpad * cbytes           # im2col scratch
                     + 2 * Cpad * 4)           # f32 accumulator value (+slack)
    max_rows = max(256, (vmem_limit - fixed_bytes) // per_row_bytes)
    TH = _pick_row_tile(Ho, Wo, target_rows=min(1024, max_rows),
                        max_rows=max_rows)
    n_tiles = -(-Ho // TH)
    Ho_pad = n_tiles * TH
    Hpp = Ho_pad + KH - 1                        # padded-image rows kernel sees

    # --- layout glue (fused by XLA into one relayout pass each way) ----------
    # NCHW -> NHWC, cast to compute dtype, zero pad: `padding` halo plus
    # (Ho_pad - Ho) extra bottom rows for the ragged last row tile.
    # TODO(synk): for a full NHWC network these boundary transposes (and the
    # pad, via masked halo DMA) should be hoisted out of the per-layer path.
    x_nhwc = jnp.transpose(x_nchw, (0, 2, 3, 1)).astype(compute_dtype)
    x_pad = jnp.pad(
        x_nhwc,
        ((0, 0), (padding, padding + (Ho_pad - Ho)), (padding, padding), (0, 0)))

    # Weights OIHW -> lane-dense slab (Kpad, Cpad); rows >= K are zero so the
    # lane-padded contraction is exact.  Bias stays f32 for the epilogue.
    w2d = jnp.transpose(weight_oihw, (2, 3, 1, 0)).reshape(K, Cout)
    w_slab = jnp.zeros((Kpad, Cpad), compute_dtype)
    w_slab = w_slab.at[:K, :Cout].set(w2d.astype(compute_dtype))
    b_slab = jnp.zeros((1, Cpad), jnp.float32).at[0, :Cout].set(
        bias.astype(jnp.float32))

    # v7x (2 TensorCores): shard the grid on batch when possible so each core
    # keeps its per-batch image block VMEM-resident across the tile axis.
    dim_sem = ("parallel", "arbitrary") if N > 1 else ("arbitrary", "parallel")

    kernel = functools.partial(_conv_relu_kernel, KH=KH, KW=KW, TH=TH, Wo=Wo)

    out_flat = pl.pallas_call(
        kernel,
        out_shape=jax.ShapeDtypeStruct((N, Ho_pad * Wo, Cout), out_dtype),
        grid_spec=pltpu.PrefetchScalarGridSpec(
            num_scalar_prefetch=0,
            grid=(N, n_tiles),
            in_specs=[
                # Padded image: re-DMA'd only when the batch index changes.
                pl.BlockSpec((None, Hpp, Wp, Cin), lambda n, t: (n, 0, 0, 0)),
                # Weight slab + bias: resident across the whole grid.
                # TODO(synk): single-buffer these constant blocks
                # (pl.Buffered(1)) to reclaim Kpad*Cpad*cbytes of VMEM; the
                # double-buffer waste is already counted in the budget above.
                pl.BlockSpec((Kpad, Cpad), lambda n, t: (0, 0)),
                pl.BlockSpec((1, Cpad), lambda n, t: (0, 0)),
            ],
            out_specs=pl.BlockSpec((None, TH * Wo, Cout),
                                   lambda n, t: (n, t, 0)),
            scratch_shapes=[pltpu.VMEM((TH * Wo, Kpad), compute_dtype)],
        ),
        compiler_params=pltpu.CompilerParams(
            dimension_semantics=dim_sem,
            vmem_limit_bytes=vmem_limit,
        ),
    )(x_pad, w_slab, b_slab)

    # Glue: drop the ragged pad rows, back to NCHW to match PyTorch.
    out = out_flat.reshape(N, Ho_pad, Wo, Cout)[:, :Ho]
    return jnp.transpose(out, (0, 3, 1, 2))


if __name__ == "__main__":
    key = jax.random.PRNGKey(0)
    k_x, k_w, k_b = jax.random.split(key, 3)

    # Small shapes consistent with the module's forward.
    N, Cin, H, W = 2, 4, 16, 16
    Cout, KH, KW = 8, 3, 3

    x = jax.random.normal(k_x, (N, Cin, H, W), dtype=jnp.float32)
    fan_in = Cin * KH * KW
    bound = 1.0 / np.sqrt(fan_in)
    weight = jax.random.uniform(
        k_w, (Cout, Cin, KH, KW), minval=-bound, maxval=bound, dtype=jnp.float32)
    bias = jax.random.uniform(
        k_b, (Cout,), minval=-bound, maxval=bound, dtype=jnp.float32)

    def reference(xr, wr):
        r = jax.lax.conv_general_dilated(
            xr, wr, window_strides=(1, 1), padding=((1, 1), (1, 1)),
            dimension_numbers=("NCHW", "OIHW", "NCHW"),
        ) + bias.reshape(1, Cout, 1, 1)
        return jnp.maximum(r, 0.0)

    # Strict check: f32 compute path against the f32 XLA reference.
    out_f32 = jax.block_until_ready(
        basic_conv2d(x, weight, bias, padding=1, compute_dtype=jnp.float32))
    assert out_f32.shape == (N, Cout, H, W)
    np.testing.assert_allclose(np.asarray(out_f32),
                               np.asarray(reference(x, weight)),
                               rtol=1e-5, atol=1e-5)

    # Default path (bf16 MXU inputs, f32 accumulation): compare against the
    # reference evaluated on bf16-rounded inputs.
    out_bf16 = jax.block_until_ready(basic_conv2d(x, weight, bias, padding=1))
    assert out_bf16.shape == (N, Cout, H, W)
    x_r = x.astype(jnp.bfloat16).astype(jnp.float32)
    w_r = weight.astype(jnp.bfloat16).astype(jnp.float32)
    np.testing.assert_allclose(np.asarray(out_bf16),
                               np.asarray(reference(x_r, w_r)),
                               rtol=5e-3, atol=5e-3)

    print("KERNEL_OK")
</pallas_src>

<mosaic_0001>
module attributes {stable_mosaic.version = 11 : i64} {
  func.func @_conv_relu_kernel(%arg0: i32, %arg1: i32, %arg2: memref<1x18x18x4xf32, #tpu.memory_space<vmem>>, %arg3: memref<128x128xf32, #tpu.memory_space<vmem>>, %arg4: memref<1x128xf32, #tpu.memory_space<vmem>>, %arg5: memref<1x256x8xf32, #tpu.memory_space<vmem>>, %arg6: memref<256x128xf32, #tpu.memory_space<vmem>>) attributes {dimension_semantics = [#tpu.dimension_semantics<parallel>, #tpu.dimension_semantics<arbitrary>], iteration_bounds = array<i64: 2, 1>, scalar_prefetch = 0 : i64, scratch_operands = 1 : i64, tpu.core_type = #tpu.core_type<tc>, window_params = [{transform_indices = @transform_0, window_bounds = array<i64: 1, 18, 18, 4>}, {pipeline_mode = #tpu.pipeline_mode<synchronous>, transform_indices = @transform_1, window_bounds = array<i64: 128, 128>}, {pipeline_mode = #tpu.pipeline_mode<synchronous>, transform_indices = @transform_2, window_bounds = array<i64: 1, 128>}, {transform_indices = @transform_3, window_bounds = array<i64: 1, 256, 8>}]} {
    %c16_i32 = arith.constant 16 : i32
    %0 = arith.muli %arg1, %c16_i32 : i32
    %1 = tpu.assume_multiple %0, 16 : i32
    %c0 = arith.constant 0 : index
    %2 = arith.index_cast %1 : i32 to index
    %c0_0 = arith.constant 0 : index
    %c0_1 = arith.constant 0 : index
    %3 = vector.load %arg2[%c0, %2, %c0_0, %c0_1] : memref<1x18x18x4xf32, #tpu.memory_space<vmem>>, vector<1x18x18x4xf32>
    %4 = vector.shape_cast %3 : vector<1x18x18x4xf32> to vector<18x18x4xf32>
    %5 = vector.extract_strided_slice %4 {offsets = [0, 0, 0], sizes = [16, 16, 4], strides = [1, 1, 1]} : vector<18x18x4xf32> to vector<16x16x4xf32>
    %6 = vector.shape_cast %5 : vector<16x16x4xf32> to vector<256x4xf32>
    %c0_2 = arith.constant 0 : index
    %c0_3 = arith.constant 0 : index
    %7 = vector.load %arg6[%c0_2, %c0_3] : memref<256x128xf32, #tpu.memory_space<vmem>>, vector<256x4xf32>
    tpu.vector_store %arg6[%c0_2, %c0_3], %6 {strides = array<i32>} : memref<256x128xf32, #tpu.memory_space<vmem>>, vector<256x4xf32>,
    %8 = vector.extract_strided_slice %4 {offsets = [0, 1, 0], sizes = [16, 16, 4], strides = [1, 1, 1]} : vector<18x18x4xf32> to vector<16x16x4xf32>
    %9 = vector.shape_cast %8 : vector<16x16x4xf32> to vector<256x4xf32>
    %c0_4 = arith.constant 0 : index
    %c4 = arith.constant 4 : index
    %10 = vector.load %arg6[%c0_4, %c4] : memref<256x128xf32, #tpu.memory_space<vmem>>, vector<256x4xf32>
    tpu.vector_store %arg6[%c0_4, %c4], %9 {strides = array<i32>} : memref<256x128xf32, #tpu.memory_space<vmem>>, vector<256x4xf32>,
    %11 = vector.extract_strided_slice %4 {offsets = [0, 2, 0], sizes = [16, 16, 4], strides = [1, 1, 1]} : vector<18x18x4xf32> to vector<16x16x4xf32>
    %12 = vector.shape_cast %11 : vector<16x16x4xf32> to vector<256x4xf32>
    %c0_5 = arith.constant 0 : index
    %c8 = arith.constant 8 : index
    %13 = vector.load %arg6[%c0_5, %c8] : memref<256x128xf32, #tpu.memory_space<vmem>>, vector<256x4xf32>
    tpu.vector_store %arg6[%c0_5, %c8], %12 {strides = array<i32>} : memref<256x128xf32, #tpu.memory_space<vmem>>, vector<256x4xf32>,
    %14 = vector.extract_strided_slice %4 {offsets = [1, 0, 0], sizes = [16, 16, 4], strides = [1, 1, 1]} : vector<18x18x4xf32> to vector<16x16x4xf32>
    %15 = vector.shape_cast %14 : vector<16x16x4xf32> to vector<256x4xf32>
    %c0_6 = arith.constant 0 : index
    %c12 = arith.constant 12 : index
    %16 = vector.load %arg6[%c0_6, %c12] : memref<256x128xf32, #tpu.memory_space<vmem>>, vector<256x4xf32>
    tpu.vector_store %arg6[%c0_6, %c12], %15 {strides = array<i32>} : memref<256x128xf32, #tpu.memory_space<vmem>>, vector<256x4xf32>,
    %17 = vector.extract_strided_slice %4 {offsets = [1, 1, 0], sizes = [16, 16, 4], strides = [1, 1, 1]} : vector<18x18x4xf32> to vector<16x16x4xf32>
    %18 = vector.shape_cast %17 : vector<16x16x4xf32> to vector<256x4xf32>
    %c0_7 = arith.constant 0 : index
    %c16 = arith.constant 16 : index
    %19 = vector.load %arg6[%c0_7, %c16] : memref<256x128xf32, #tpu.memory_space<vmem>>, vector<256x4xf32>
    tpu.vector_store %arg6[%c0_7, %c16], %18 {strides = array<i32>} : memref<256x128xf32, #tpu.memory_space<vmem>>, vector<256x4xf32>,
    %20 = vector.extract_strided_slice %4 {offsets = [1, 2, 0], sizes = [16, 16, 4], strides = [1, 1, 1]} : vector<18x18x4xf32> to vector<16x16x4xf32>
    %21 = vector.shape_cast %20 : vector<16x16x4xf32> to vector<256x4xf32>
    %c0_8 = arith.constant 0 : index
    %c20 = arith.constant 20 : index
    %22 = vector.load %arg6[%c0_8, %c20] : memref<256x128xf32, #tpu.memory_space<vmem>>, vector<256x4xf32>
    tpu.vector_store %arg6[%c0_8, %c20], %21 {strides = array<i32>} : memref<256x128xf32, #tpu.memory_space<vmem>>, vector<256x4xf32>,
    %23 = vector.extract_strided_slice %4 {offsets = [2, 0, 0], sizes = [16, 16, 4], strides = [1, 1, 1]} : vector<18x18x4xf32> to vector<16x16x4xf32>
    %24 = vector.shape_cast %23 : vector<16x16x4xf32> to vector<256x4xf32>
    %c0_9 = arith.constant 0 : index
    %c24 = arith.constant 24 : index
    %25 = vector.load %arg6[%c0_9, %c24] : memref<256x128xf32, #tpu.memory_space<vmem>>, vector<256x4xf32>
    tpu.vector_store %arg6[%c0_9, %c24], %24 {strides = array<i32>} : memref<256x128xf32, #tpu.memory_space<vmem>>, vector<256x4xf32>,
    %26 = vector.extract_strided_slice %4 {offsets = [2, 1, 0], sizes = [16, 16, 4], strides = [1, 1, 1]} : vector<18x18x4xf32> to vector<16x16x4xf32>
    %27 = vector.shape_cast %26 : vector<16x16x4xf32> to vector<256x4xf32>
    %c0_10 = arith.constant 0 : index
    %c28 = arith.constant 28 : index
    %28 = vector.load %arg6[%c0_10, %c28] : memref<256x128xf32, #tpu.memory_space<vmem>>, vector<256x4xf32>
    tpu.vector_store %arg6[%c0_10, %c28], %27 {strides = array<i32>} : memref<256x128xf32, #tpu.memory_space<vmem>>, vector<256x4xf32>,
    %29 = vector.extract_strided_slice %4 {offsets = [2, 2, 0], sizes = [16, 16, 4], strides = [1, 1, 1]} : vector<18x18x4xf32> to vector<16x16x4xf32>
    %30 = vector.shape_cast %29 : vector<16x16x4xf32> to vector<256x4xf32>
    %c0_11 = arith.constant 0 : index
    %c32 = arith.constant 32 : index
    %31 = vector.load %arg6[%c0_11, %c32] : memref<256x128xf32, #tpu.memory_space<vmem>>, vector<256x4xf32>
    tpu.vector_store %arg6[%c0_11, %c32], %30 {strides = array<i32>} : memref<256x128xf32, #tpu.memory_space<vmem>>, vector<256x4xf32>,
    %cst = arith.constant 0.000000e+00 : f32
    %32 = vector.broadcast %cst : f32 to vector<256x92xf32>
    %c0_12 = arith.constant 0 : index
    %c36 = arith.constant 36 : index
    %33 = vector.load %arg6[%c0_12, %c36] : memref<256x128xf32, #tpu.memory_space<vmem>>, vector<256x92xf32>
    tpu.vector_store %arg6[%c0_12, %c36], %32 {strides = array<i32>} : memref<256x128xf32, #tpu.memory_space<vmem>>, vector<256x92xf32>,
    %c0_13 = arith.constant 0 : index
    %c0_14 = arith.constant 0 : index
    %34 = vector.load %arg6[%c0_13, %c0_14] : memref<256x128xf32, #tpu.memory_space<vmem>>, vector<256x128xf32>
    %c0_15 = arith.constant 0 : index
    %c0_16 = arith.constant 0 : index
    %35 = vector.load %arg3[%c0_15, %c0_16] : memref<128x128xf32, #tpu.memory_space<vmem>>, vector<128x128xf32>
    %cst_17 = arith.constant dense<0.000000e+00> : vector<256x128xf32>
    %36 = tpu.matmul %34, %35, %cst_17 {dimension_numbers = #tpu.dot_dimension_numbers<[1], [0], [0], [1], [0, 0, 1, 1], [], []>} : vector<256x128xf32>, vector<128x128xf32>, vector<256x128xf32> -> vector<256x128xf32>
    %c0_18 = arith.constant 0 : index
    %c0_19 = arith.constant 0 : index
    %37 = vector.load %arg4[%c0_18, %c0_19] : memref<1x128xf32, #tpu.memory_space<vmem>>, vector<1x128xf32>
    %38 = vector.broadcast %37 : vector<1x128xf32> to vector<256x128xf32>
    %39 = arith.addf %36, %38 : vector<256x128xf32>
    %cst_20 = arith.constant 0.000000e+00 : f32
    %40 = vector.broadcast %cst_20 : f32 to vector<256x128xf32>
    %41 = arith.maximumf %39, %40 : vector<256x128xf32>
    %42 = vector.extract_strided_slice %41 {offsets = [0, 0], sizes = [256, 8], strides = [1, 1]} : vector<256x128xf32> to vector<256x8xf32>
    %c0_21 = arith.constant 0 : index
    %c0_22 = arith.constant 0 : index
    %c0_23 = arith.constant 0 : index
    %43 = vector.load %arg5[%c0_21, %c0_22, %c0_23] : memref<1x256x8xf32, #tpu.memory_space<vmem>>, vector<1x256x8xf32>
    %44 = vector.shape_cast %43 : vector<1x256x8xf32> to vector<256x8xf32>
    %45 = vector.shape_cast %42 : vector<256x8xf32> to vector<1x256x8xf32>
    tpu.vector_store %arg5[%c0_21, %c0_22, %c0_23], %45 {strides = array<i32>} : memref<1x256x8xf32, #tpu.memory_space<vmem>>, vector<1x256x8xf32>,
    return
  }
  func.func @transform_0(%arg0: i32, %arg1: i32) -> (i32, i32, i32, i32) {
    %c0_i32 = arith.constant 0 : i32
    %c0_i32_0 = arith.constant 0 : i32
    %c0_i32_1 = arith.constant 0 : i32
    %c0_i32_2 = arith.constant 0 : i32
    return %arg0, %c0_i32, %c0_i32_0, %c0_i32_1 : i32, i32, i32, i32
  }
  func.func @transform_1(%arg0: i32, %arg1: i32) -> (i32, i32) {
    %c0_i32 = arith.constant 0 : i32
    %c0_i32_0 = arith.constant 0 : i32
    %c0_i32_1 = arith.constant 0 : i32
    return %c0_i32, %c0_i32_0 : i32, i32
  }
  func.func @transform_2(%arg0: i32, %arg1: i32) -> (i32, i32) {
    %c0_i32 = arith.constant 0 : i32
    %c0_i32_0 = arith.constant 0 : i32
    %c0_i32_1 = arith.constant 0 : i32
    return %c0_i32, %c0_i32_0 : i32, i32
  }
  func.func @transform_3(%arg0: i32, %arg1: i32) -> (i32, i32, i32) {
    %c0_i32 = arith.constant 0 : i32
    %c0_i32_0 = arith.constant 0 : i32
    return %arg0, %arg1, %c0_i32 : i32, i32, i32
  }
}

</mosaic_0001>

<bundles_post_ra>
// kernel: basic_conv2d.1
= control target key start
LH: loop header
LB: loop body
LE: loop exit
PB: predicated region body
PF: predicated region fallthrough
CT: control target
= control target key end

     0   :  { %s2288_s12 = smov 0   ;;  %s2290_s13 = smov 0   ;;  %s3810_s0 = inlined_call_operand.vmem [shape: f32[2,18,18,4], index: 0, kind: input, shape index: {}]   ;;  %s3811_s1 = inlined_call_operand.vmem [shape: f32[128,128], index: 1, kind: input, shape index: {}]   ;;  %s3812_s2 = inlined_call_operand.vmem [shape: f32[1,128], index: 2, kind: input, shape index: {}]   ;;  %s3813_s3 = inlined_call_operand.vmem [shape: f32[2,256,8], index: 3, kind: output, shape index: {}]  }
   0x1   :  { %s2292_s14 = smov 0  }
   0x2 LB: > { %s25_s15 = sadd.s32 1, %s2253_s13  ;;  %p2017_p0 = scmp.ge.s32.totalorder %s2257_s14, 1  ;;  %s2257_s14 = sphi %s2292_s14, %s13_s14   ;;  %s2253_s13 = sphi %s2290_s13, %s3947_s13   ;;  %s2249_s12 = sphi %s2288_s12, %s3946_s12  }
   0x3   : > { %p27_p1 = scmp.ge.s32.totalorder %s25_s15, 2  ;;  %p151_p2 = scmp.lt.s32.totalorder %s2257_s14, 3 }
   0x5   : > { %s3949_s15 = smov (%p27_p1, %s25_s15), 0  ;;  %p152_p3 = pnand %p2017_p0, %p151_p2 }
   0x7   : > { %155 = sbr.rel (%p152_p3) target bundleno = 876 (0x36c), region = 32 }
   0xe   : > { %p179_p4 = scmp.lt.s32.totalorder %s2249_s12, 1  ;;  %vm251_vm0 = vcmask 31744   ;;  %vm332_vm1 = vcmask 1046528   ;;  %s2259_s20 = smov 4   ;;  %vm542_vm2 = vcmask 1045504   ;;  %vm509_vm3 = vcmask 64544  }
   0xf   : > { %s2260_s21 = smov 8   ;;  %s2261_s22 = smov 12   ;;  %vm719_vm4 = vcmask 97344   ;;  %vm850_vm5 = vcmask 130144   ;;  %vm985_vm6 = vcmask 162944   ;;  %vm1119_vm7 = vcmask 195744  }
  0x10   : > { %s3951_s12 = smov (!%p179_p4, %s2249_s12), 1  ;;  %s2262_s23 = smov 16   ;;  %vm1250_vm8 = vcmask 228544   ;;  %vm1385_vm9 = vcmask 261344   ;;  %vm1519_vm10 = vcmask 294144   ;;  %vm1552_vm11 = vcmask 1047840  }
  0x11   : > { %s2201_s16 = smul.u32 432, %s3951_s12  ;;  %s2263_s24 = smov 20   ;;  %vm1897_vm12 = vcmask 64512  }
  0x12   : > { %s2264_s25 = smov 24   ;;  %s2265_s26 = smov 28  }
  0x13   : > { %s2312_s19 = scalar_lea.vmem %s3810_s0, %s2201_s16  ;;  %s2266_s27 = smov 32  }
  0x14   : > { %v2315_v0 = vld [vmem:[%s2312_s19 + $0x18] sm:$0xff]  ;;  %v2318_v1 = vld [vmem:[%s2312_s19 + $0x20] sm:$0xff]  ;;  %v2326_v5 = vld [vmem:[%s2312_s19 + $0x8] sm:$0xff] }
  0x15   : > { %v2321_v2 = vld [vmem:[%s2312_s19] sm:$0xff]  ;;  %v338_v3 = vrot.slane %v2315_v0, 1  ;;  %v339_v4 = vrot.slane %v2318_v1, 1  ;;  %v2330_v7 = vld [vmem:[%s2312_s19 + $0x28] sm:$0x3]  ;;  %254 = vst.msk [vmem:[#allocation2 + $0x10] sm:$0xff] %vm251_vm0, %v2315_v0 }
  0x16   : > { %v333_v6 = vrot.slane %v2321_v2, 1  ;;  %252 = vst.msk [vmem:[#allocation2] sm:$0xff] %vm251_vm0, %v2321_v2  ;;  %255 = vst.msk [vmem:[#allocation2 + $0x18] sm:$0xff] %vm251_vm0, %v2318_v1  ;;  %v334_v8 = vrot.slane %v2326_v5, 1  ;;  %v341_v9 = vrot.slane %v2330_v7, 1  ;;  %v2344_v11 = vld [vmem:[%s2312_s19 + $0x38] sm:$0xff] }
  0x17   : > { %v2341_v10 = vld [vmem:[%s2312_s19 + $0x10] sm:$0x3]  ;;  %253 = vst.msk [vmem:[#allocation2 + $0x8] sm:$0xff] %vm251_vm0, %v2326_v5  ;;  %v2352_v13 = vsel %vm332_vm1, %v338_v3, %v339_v4  ;;  %v2356_v15 = vld [vmem:[%s2312_s19 + $0x40] sm:$0x3]  ;;  %257 = vst.msk [vmem:[#allocation2 + $0x28] sm:$0xff] %vm251_vm0, %v2344_v11 }
  0x18   : > { %v2347_v12 = vld [vmem:[%s2312_s19 + $0x30] sm:$0xff]  ;;  %v336_v14 = vrot.slane %v2341_v10, 1  ;;  %417 = vrot.lane.b32.xlu1 %v2352_v13, %s2259_s20  ;;  %v335_v17 = vsel %vm332_vm1, %v333_v6, %v334_v8  ;;  %v2369_v18 = vld [vmem:[%s2312_s19 + $0x48] sm:$0xff]  ;;  %v2378_v20 = vsel %vm332_vm1, %v339_v4, %v341_v9  ;;  %v344_v21 = vrot.slane %v2344_v11, 1  ;;  %v2383_v23 = vld [vmem:[%s2312_s19 + $0x60] sm:$0xff] }
  0x19   : > { %v2359_v16 = vld [vmem:[%s2312_s19 + $0x50] sm:$0xff]  ;;  %256 = vst.msk [vmem:[#allocation2 + $0x20] sm:$0xff] %vm251_vm0, %v2347_v12  ;;  %v2372_v19 = vld [vmem:[%s2312_s19 + $0x68] sm:$0xff]  ;;  %413 = vrot.lane.b32.xlu0 %v335_v17, %s2259_s20  ;;  %v346_v22 = vrot.slane %v2356_v15, 1  ;;  %v2386_v24 = vld [vmem:[%s2312_s19 + $0x80] sm:$0xff]  ;;  %v343_v26 = vrot.slane %v2347_v12, 1 }
  0x1a   : > { %259 = vst.msk [vmem:[#allocation2 + $0x38] sm:$0xff] %vm251_vm0, %v2359_v16  ;;  %258 = vst.msk [vmem:[#allocation2 + $0x30] sm:$0xff] %vm251_vm0, %v2369_v18  ;;  %v337_v25 = vsel %vm332_vm1, %v334_v8, %v336_v14  ;;  %v2395_v27 = vld [vmem:[%s2312_s19 + $0x58] sm:$0x3]  ;;  %v2408_v30 = vld [vmem:[%s2312_s19 + $0x90] sm:$0xff]  ;;  %v349_v34 = vrot.slane %v2359_v16, 1 }
  0x1b   : > { %261 = vst.msk [vmem:[#allocation2 + $0x48] sm:$0xff] %vm251_vm0, %v2372_v19  ;;  %v2398_v28 = vld [vmem:[%s2312_s19 + $0x78] sm:$0xff]  ;;  %260 = vst.msk [vmem:[#allocation2 + $0x40] sm:$0xff] %vm251_vm0, %v2383_v23  ;;  %v2415_v31 = vld [vmem:[%s2312_s19 + $0xb0] sm:$0xff]  ;;  %v2426_v33 = vsel %vm332_vm1, %v344_v21, %v346_v22  ;;  %v351_v35 = vrot.slane %v2395_v27, 1  ;;  %v2441_v38 = vsel %vm332_vm1, %v343_v26, %v344_v21  ;;  %v348_v39 = vrot.slane %v2369_v18, 1 }
  0x1c   : > { %263 = vst.msk [vmem:[#allocation2 + $0x58] sm:$0xff] %vm251_vm0, %v2386_v24  ;;  %v2405_v29 = vld [vmem:[%s2312_s19 + $0x98] sm:$0xff]  ;;  %262 = vst.msk [vmem:[#allocation2 + $0x50] sm:$0xff] %vm251_vm0, %v2398_v28  ;;  %419 = vrot.lane.b32.xlu1 %v2378_v20, %s2259_s20  ;;  %v2418_v32 = vld [vmem:[%s2312_s19 + $0xa8] sm:$0xff]  ;;  %v354_v48 = vrot.slane %v2372_v19, 1  ;;  %v353_v53 = vrot.slane %v2383_v23, 1 }
  0x1d   : > { %264 = vst.msk [vmem:[#allocation2 + $0x60] sm:$0xff] %vm251_vm0, %v2408_v30  ;;  %265 = vst.msk [vmem:[#allocation2 + $0x68] sm:$0xff] %vm251_vm0, %v2405_v29  ;;  %415 = vrot.lane.b32.xlu0 %v337_v25, %s2259_s20  ;;  %v2431_v36 = vld [vmem:[%s2312_s19 + $0x70] sm:$0x3]  ;;  %v2434_v37 = vld [vmem:[%s2312_s19 + $0xc8] sm:$0xff]  ;;  %v2482_v47 = vsel %vm332_vm1, %v349_v34, %v351_v35  ;;  %v2497_v52 = vsel %vm332_vm1, %v348_v39, %v349_v34  ;;  %v359_v60 = vrot.slane %v2386_v24, 1 }
  0x1e   : > { %3880 = vst [vmem:[#allocation3_spill] sm:$0xff] %v2426_v33  ;;  %266 = vst.msk [vmem:[#allocation2 + $0x70] sm:$0xff] %vm251_vm0, %v2418_v32  ;;  %v2445_v40 = vld [vmem:[%s2312_s19 + $0xc0] sm:$0xff]  ;;  %v2451_v42 = vld [vmem:[%s2312_s19 + $0xd8] sm:$0xff]  ;;  %v356_v49 = vrot.slane %v2431_v36, 1  ;;  %v2543_v3 = vsel %vm332_vm1, %v353_v53, %v354_v48  ;;  %v358_v4 = vrot.slane %v2398_v28, 1 }
  0x1f   : > { %267 = vst.msk [vmem:[#allocation2 + $0x78] sm:$0xff] %vm251_vm0, %v2415_v31  ;;  %3881 = vst [vmem:[#allocation4_spill] sm:$0xff] %v2441_v38  ;;  %v2448_v41 = vld [vmem:[%s2312_s19 + $0xe0] sm:$0xff]  ;;  %v2456_v43 = vld [vmem:[%s2312_s19 + $0xf8] sm:$0xff]  ;;  %v364_v9 = vrot.slane %v2405_v29, 1  ;;  %v363_v21 = vrot.slane %v2408_v30, 1 }
  0x20   : > { %269 = vst.msk [vmem:[#allocation2 + $0x88] sm:$0xff] %vm251_vm0, %v2434_v37  ;;  %v2459_v44 = vld [vmem:[%s2312_s19 + $0xf0] sm:$0xff]  ;;  %268 = vst.msk [vmem:[#allocation2 + $0x80] sm:$0xff] %vm251_vm0, %v2445_v40  ;;  %423 = vrot.lane.b32.xlu1 %v2426_v33, %s2259_s20  ;;  %v2473_v46 = vld [vmem:[%s2312_s19 + $0x108] sm:$0xff]  ;;  %v2528_v59 = vsel %vm332_vm1, %v354_v48, %v356_v49  ;;  %v2563_v17 = vsel %vm332_vm1, %v358_v4, %v359_v60  ;;  %v369_v26 = vrot.slane %v2415_v31, 1  ;;  %v368_v39 = vrot.slane %v2418_v32, 1 }
  0x21   : > { %270 = vst.msk [vmem:[#allocation2 + $0x90] sm:$0xff] %vm251_vm0, %v2451_v42  ;;  %271 = vst.msk [vmem:[#allocation2 + $0x98] sm:$0xff] %vm251_vm0, %v2448_v41  ;;  %v2470_v45 = vld [vmem:[%s2312_s19 + $0x110] sm:$0xff]  ;;  %421 = vrot.lane.b32.xlu0 %v2441_v38, %s2259_s20  ;;  %v2487_v50 = vld [vmem:[%s2312_s19 + $0x128] sm:$0xff]  ;;  %v2579_v35 = vsel %vm332_vm1, %v363_v21, %v364_v9  ;;  %v374_v53 = vrot.slane %v2434_v37, 1  ;;  %v373_v4 = vrot.slane %v2445_v40, 1 }
  0x22   : > { %272 = vst.msk [vmem:[#allocation2 + $0xa0] sm:$0xff] %vm251_vm0, %v2459_v44  ;;  %273 = vst.msk [vmem:[#allocation2 + $0xa8] sm:$0xff] %vm251_vm0, %v2456_v43  ;;  %v2490_v51 = vld [vmem:[%s2312_s19 + $0x120] sm:$0xff]  ;;  %v2501_v54 = vld [vmem:[%s2312_s19 + $0x88] sm:$0x3]  ;;  %v379_v21 = vrot.slane %v2448_v41, 1 }
  0x23   : > { %3882 = vst [vmem:[#allocation5_spill] sm:$0xff] %v2482_v47  ;;  %274 = vst.msk [vmem:[#allocation2 + $0xb0] sm:$0xff] %vm251_vm0, %v2473_v46  ;;  %v2504_v55 = vld [vmem:[%s2312_s19 + $0x140] sm:$0xff]  ;;  %v2511_v56 = vld [vmem:[%s2312_s19 + $0x138] sm:$0xff]  ;;  %v361_v61 = vrot.slane %v2501_v54, 1 }
  0x24   : > { %275 = vst.msk [vmem:[#allocation2 + $0xb8] sm:$0xff] %vm251_vm0, %v2470_v45  ;;  %3883 = vst [vmem:[#allocation6_spill] sm:$0xff] %v2497_v52  ;;  %427 = vrot.lane.b32.xlu1 %v2482_v47, %s2259_s20  ;;  %v2518_v57 = vld [vmem:[%s2312_s19 + $0x158] sm:$0xff]  ;;  %v2521_v58 = vld [vmem:[%s2312_s19 + $0x150] sm:$0xff]  ;;  %v399_v47 = vrot.slane %v2504_v55, 1 }
  0x25   : > { %276 = vst.msk [vmem:[#allocation2 + $0xc0] sm:$0xff] %vm251_vm0, %v2490_v51  ;;  %277 = vst.msk [vmem:[#allocation2 + $0xc8] sm:$0xff] %vm251_vm0, %v2487_v50  ;;  %425 = vrot.lane.b32.xlu0 %v2497_v52, %s2259_s20  ;;  %v2533_v62 = vld [vmem:[%s2312_s19 + $0x170] sm:$0xff]  ;;  %v2536_v63 = vld [vmem:[%s2312_s19 + $0x168] sm:$0xff]  ;;  %v2558_v8 = vsel %vm332_vm1, %v359_v60, %v361_v61  ;;  %v2595_v61 = vsel %vm332_vm1, %v368_v39, %v369_v26  ;;  %v378_v39 = vrot.slane %v2451_v42, 1 }
  0x26   : > { %279 = vst.msk [vmem:[#allocation2 + $0xd8] sm:$0xff] %vm251_vm0, %v2504_v55  ;;  %278 = vst.msk [vmem:[#allocation2 + $0xd0] sm:$0xff] %vm251_vm0, %v2511_v56  ;;  %v2547_v6 = vld [vmem:[%s2312_s19 + $0xa0] sm:$0x3]  ;;  %v2567_v22 = vld [vmem:[%s2312_s19 + $0xb8] sm:$0x3] }
  0x27   : > { %3884 = vst [vmem:[#allocation7_spill] sm:$0xff] %v2528_v59  ;;  %280 = vst.msk [vmem:[#allocation2 + $0xe0] sm:$0xff] %vm251_vm0, %v2521_v58  ;;  %v366_v14 = vrot.slane %v2547_v6, 1  ;;  %v371_v34 = vrot.slane %v2567_v22, 1  ;;  %v2583_v48 = vld [vmem:[%s2312_s19 + $0xd0] sm:$0x3] }
  0x28   : > { %281 = vst.msk [vmem:[#allocation2 + $0xe8] sm:$0xff] %vm251_vm0, %v2518_v57  ;;  %3885 = vst [vmem:[#allocation8_spill] sm:$0xff] %v2543_v3  ;;  %431 = vrot.lane.b32.xlu1 %v2528_v59, %s2259_s20  ;;  %v376_v60 = vrot.slane %v2583_v48, 1  ;;  %v2679_v33 = vld [vmem:[%s2312_s19 + $0x160] sm:$0x3] }
  0x29   : > { %282 = vst.msk [vmem:[#allocation2 + $0xf0] sm:$0xff] %vm251_vm0, %v2536_v63  ;;  %283 = vst.msk [vmem:[#allocation2 + $0xf8] sm:$0xff] %vm251_vm0, %v2533_v62  ;;  %429 = vrot.lane.b32.xlu0 %v2543_v3, %s2259_s20  ;;  %v2574_v25 = vsel %vm332_vm1, %v364_v9, %v366_v14  ;;  %v2590_v49 = vsel %vm332_vm1, %v369_v26, %v371_v34  ;;  %v2599_v9 = vld [vmem:[%s2312_s19 + $0xe8] sm:$0x3]  ;;  %v2611_v26 = vsel %vm332_vm1, %v373_v4, %v374_v53 }
  0x2a   : > { %3886 = vst [vmem:[#allocation9_spill] sm:$0xff] %v2558_v8  ;;  %3887 = vst [vmem:[#allocation10_spill] sm:$0xff] %v2563_v17  ;;  %v2606_v14 = vsel %vm332_vm1, %v374_v53, %v376_v60  ;;  %v381_v34 = vrot.slane %v2599_v9, 1  ;;  %v2627_v53 = vsel %vm332_vm1, %v378_v39, %v379_v21  ;;  %v383_v4 = vrot.slane %v2459_v44, 1  ;;  %v2663_v3 = vld [vmem:[%s2312_s19 + $0x148] sm:$0x3] }
  0x2b   : > { %3888 = vst [vmem:[#allocation11_spill] sm:$0xff] %v2574_v25  ;;  %3889 = vst [vmem:[#allocation12_spill] sm:$0xff] %v2579_v35  ;;  %v388_v39 = vrot.slane %v2473_v46, 1  ;;  %v401_v52 = vrot.slane %v2663_v3, 1 }
  0x2c   : > { %435 = vrot.lane.b32.xlu1 %v2558_v8, %s2259_s20  ;;  %3890 = vst [vmem:[#allocation13_spill] sm:$0xff] %v2590_v49  ;;  %3891 = vst [vmem:[#allocation14_spill] sm:$0xff] %v2595_v61  ;;  %v2622_v60 = vsel %vm332_vm1, %v379_v21, %v381_v34  ;;  %v2647_v8 = vld [vmem:[%s2312_s19 + $0x130] sm:$0x3] }
  0x2d   : > { %433 = vrot.lane.b32.xlu0 %v2563_v17, %s2259_s20  ;;  %3892 = vst [vmem:[#allocation15_spill] sm:$0xff] %v2606_v14  ;;  %3893 = vst [vmem:[#allocation16_spill] sm:$0xff] %v2611_v26  ;;  %v394_v17 = vrot.slane %v2487_v50, 1  ;;  %v396_v59 = vrot.slane %v2647_v8, 1 }
  0x30   : > { %439 = vrot.lane.b32.xlu1 %v2574_v25, %s2259_s20  ;;  %v2615_v25 = vld [vmem:[%s2312_s19 + $0x100] sm:$0x3] }
  0x31   : > { %437 = vrot.lane.b32.xlu0 %v2579_v35, %s2259_s20  ;;  %v2631_v35 = vld [vmem:[%s2312_s19 + $0x118] sm:$0x3] }
  0x34   : > { %443 = vrot.lane.b32.xlu1 %v2590_v49, %s2259_s20  ;;  %v384_v49 = vrot.slane %v2456_v43, 1 }
  0x35   : > { %441 = vrot.lane.b32.xlu0 %v2595_v61, %s2259_s20  ;;  %v386_v61 = vrot.slane %v2615_v25, 1 }
  0x36   : > { %v2643_v21 = vsel %vm332_vm1, %v383_v4, %v384_v49  ;;  %v393_v4 = vrot.slane %v2490_v51, 1 }
  0x37   : > { %v2638_v34 = vsel %vm332_vm1, %v384_v49, %v386_v61 }
  0x38   : > { %447 = vrot.lane.b32.xlu1 %v2606_v14, %s2259_s20  ;;  %3894 = vst [vmem:[#allocation17_spill] sm:$0xff] %v2638_v34  ;;  %v389_v14 = vrot.slane %v2470_v45, 1 }
  0x39   : > { %445 = vrot.lane.b32.xlu0 %v2611_v26, %s2259_s20  ;;  %v391_v26 = vrot.slane %v2631_v35, 1 }
  0x3a   : > { %v2659_v49 = vsel %vm332_vm1, %v388_v39, %v389_v14  ;;  %v398_v39 = vrot.slane %v2511_v56, 1 }
  0x3b   : > { %v2654_v61 = vsel %vm332_vm1, %v389_v14, %v391_v26  ;;  %3896 = vst [vmem:[#allocation19_spill] sm:$0xff] %v2659_v49  ;;  %v2670_v26 = vsel %vm332_vm1, %v394_v17, %v396_v59  ;;  %v2675_v14 = vsel %vm332_vm1, %v393_v4, %v394_v17  ;;  %v2686_v59 = vsel %vm332_vm1, %v399_v47, %v401_v52 }
  0x3c   : > { %451 = vrot.lane.b32.xlu1 %v2622_v60, %s2259_s20  ;;  %3895 = vst [vmem:[#allocation18_spill] sm:$0xff] %v2654_v61  ;;  %3897 = vst [vmem:[#allocation20_spill] sm:$0xff] %v2670_v26  ;;  %v2691_v17 = vsel %vm332_vm1, %v398_v39, %v399_v47  ;;  %v403_v4 = vrot.slane %v2521_v58, 1  ;;  %v408_v39 = vrot.slane %v2536_v63, 1 }
  0x3d   : > { %449 = vrot.lane.b32.xlu0 %v2627_v53, %s2259_s20  ;;  %3898 = vst [vmem:[#allocation21_spill] sm:$0xff] %v2675_v14  ;;  %3899 = vst [vmem:[#allocation22_spill] sm:$0xff] %v2686_v59 }
  0x3e   : > { %3900 = vst [vmem:[#allocation23_spill] sm:$0xff] %v2691_v17 }
  0x40   : > { %455 = vrot.lane.b32.xlu1 %v2638_v34, %s2259_s20  ;;  %v2695_v34 = vld [vmem:[%s2312_s19 + $0x178] sm:$0x3] }
  0x41   : > { %453 = vrot.lane.b32.xlu0 %v2643_v21, %s2259_s20 }
  0x44   : > { %459 = vrot.lane.b32.xlu1 %v2654_v61, %s2259_s20  ;;  %v404_v61 = vrot.slane %v2518_v57, 1 }
  0x45   : > { %457 = vrot.lane.b32.xlu0 %v2659_v49, %s2259_s20  ;;  %v406_v49 = vrot.slane %v2679_v33, 1 }
  0x46   : > { %v2707_v47 = vsel %vm332_vm1, %v403_v4, %v404_v61 }
  0x47   : > { %v2702_v52 = vsel %vm332_vm1, %v404_v61, %v406_v49  ;;  %3902 = vst [vmem:[#allocation25_spill] sm:$0xff] %v2707_v47  ;;  %v544_v49 = vrot.slane %v2326_v5, 2  ;;  %v543_v61 = vrot.slane %v2321_v2, 2  ;;  %v551_v5 = vrot.slane %v2330_v7, 2 }
  0x48   : > { %463 = vrot.lane.b32.xlu1 %v2670_v26, %s2259_s20  ;;  %3901 = vst [vmem:[#allocation24_spill] sm:$0xff] %v2702_v52  ;;  %v409_v26 = vrot.slane %v2533_v62, 1  ;;  %v553_v7 = vrot.slane %v2347_v12, 2 }
  0x49   : > { %461 = vrot.lane.b32.xlu0 %v2675_v14, %s2259_s20  ;;  %v411_v14 = vrot.slane %v2695_v34, 1 }
  0x4a   : > { %v2720_v38 = vsel %vm332_vm1, %v408_v39, %v409_v26  ;;  %v554_v39 = vrot.slane %v2344_v11, 2 }
  0x4b   : > { %3904 = vst [vmem:[#allocation27_spill] sm:$0xff] %v2720_v38 }
  0x4c   : > { %467 = vrot.lane.b32.xlu1 %v2686_v59, %s2259_s20  ;;  %v2715_v59 = vsel %vm332_vm1, %v409_v26, %v411_v14  ;;  %v549_v14 = vrot.slane %v2318_v1, 2  ;;  %v548_v26 = vrot.slane %v2315_v0, 2 }
  0x4d   : > { %465 = vrot.lane.b32.xlu0 %v2691_v17, %s2259_s20  ;;  %3903 = vst [vmem:[#allocation26_spill] sm:$0xff] %v2715_v59  ;;  %v546_v17 = vrot.slane %v2341_v10, 2  ;;  %v545_v10 = vsel %vm542_vm2, %v543_v61, %v544_v49  ;;  %v559_v61 = vrot.slane %v2359_v16, 2 }
  0x4e   : > { %v2735_v2 = vsel %vm542_vm2, %v549_v14, %v551_v5 }
  0x4f   : > { %v547_v4 = vsel %vm542_vm2, %v544_v49, %v546_v17  ;;  %v556_v17 = vrot.slane %v2356_v15, 2  ;;  %v2753_v15 = vsel %vm542_vm2, %v553_v7, %v554_v39  ;;  %v569_v7 = vrot.slane %v2386_v24, 2 }
  0x50   : > { %471 = vrot.lane.b32.xlu1 %v2702_v52, %s2259_s20  ;;  %v581_v52 = vrot.slane %v2567_v22, 2 }
  0x51   : > { %469 = vrot.lane.b32.xlu0 %v2707_v47, %s2259_s20  ;;  %v2748_v49 = vsel %vm542_vm2, %v554_v39, %v556_v17  ;;  %v563_v39 = vrot.slane %v2383_v23, 2  ;;  %v586_v47 = vrot.slane %v2583_v48, 2 }
  0x54   : > { %475 = vrot.lane.b32.xlu1 %v2715_v59, %s2259_s20  ;;  %v2740_v59 = vsel %vm542_vm2, %v548_v26, %v549_v14  ;;  %v558_v14 = vrot.slane %v2369_v18, 2  ;;  %v566_v26 = vrot.slane %v2431_v36, 2 }
  0x55   : > { %473 = vrot.lane.b32.xlu0 %v2720_v38, %s2259_s20  ;;  %v576_v38 = vrot.slane %v2547_v6, 2 }
  0x58   : > { %625 = vrot.lane.b32.xlu1 %v547_v4, %s2260_s21  ;;  %v561_v4 = vrot.slane %v2395_v27, 2  ;;  %v2766_v27 = vsel %vm542_vm2, %v558_v14, %v559_v61 }
  0x59   : > { %623 = vrot.lane.b32.xlu0 %v545_v10, %s2260_s21  ;;  %v564_v10 = vrot.slane %v2372_v19, 2 }
  0x5a   : > { %v2761_v5 = vsel %vm542_vm2, %v559_v61, %v561_v4  ;;  %v571_v4 = vrot.slane %v2501_v54, 2  ;;  %v568_v61 = vrot.slane %v2398_v28, 2 }
  0x5b   : > { %v2774_v17 = vsel %vm542_vm2, %v564_v10, %v566_v26  ;;  %v2779_v36 = vsel %vm542_vm2, %v563_v39, %v564_v10  ;;  %v574_v26 = vrot.slane %v2405_v29, 2  ;;  %v573_v10 = vrot.slane %v2408_v30, 2 }
  0x5c   : > { %629 = vrot.lane.b32.xlu1 %v2735_v2, %s2260_s21  ;;  %v2787_v14 = vsel %vm542_vm2, %v569_v7, %v571_v4  ;;  %v2792_v54 = vsel %vm542_vm2, %v568_v61, %v569_v7  ;;  %v579_v4 = vrot.slane %v2415_v31, 2  ;;  %v578_v7 = vrot.slane %v2418_v32, 2 }
  0x5d   : > { %627 = vrot.lane.b32.xlu0 %v2740_v59, %s2260_s21  ;;  %3905 = vst [vmem:[#allocation28_spill] sm:$0xff] %v2787_v14  ;;  %3906 = vst [vmem:[#allocation29_spill] sm:$0xff] %v2792_v54  ;;  %v2800_v39 = vsel %vm542_vm2, %v574_v26, %v576_v38  ;;  %v2805_v6 = vsel %vm542_vm2, %v573_v10, %v574_v26  ;;  %v584_v38 = vrot.slane %v2434_v37, 2  ;;  %v583_v26 = vrot.slane %v2445_v40, 2 }
  0x5e   : > { %3907 = vst [vmem:[#allocation30_spill] sm:$0xff] %v2800_v39  ;;  %3908 = vst [vmem:[#allocation31_spill] sm:$0xff] %v2805_v6  ;;  %v2813_v61 = vsel %vm542_vm2, %v579_v4, %v581_v52  ;;  %v2818_v22 = vsel %vm542_vm2, %v578_v7, %v579_v4  ;;  %v589_v52 = vrot.slane %v2448_v41, 2  ;;  %v588_v4 = vrot.slane %v2451_v42, 2 }
  0x5f   : > { %3909 = vst [vmem:[#allocation32_spill] sm:$0xff] %v2813_v61  ;;  %3910 = vst [vmem:[#allocation33_spill] sm:$0xff] %v2818_v22  ;;  %v2826_v10 = vsel %vm542_vm2, %v584_v38, %v586_v47  ;;  %v2831_v48 = vsel %vm542_vm2, %v583_v26, %v584_v38  ;;  %v594_v47 = vrot.slane %v2456_v43, 2  ;;  %v593_v38 = vrot.slane %v2459_v44, 2 }
  0x60   : > { %633 = vrot.lane.b32.xlu1 %v2748_v49, %s2260_s21  ;;  %3911 = vst [vmem:[#allocation34_spill] sm:$0xff] %v2826_v10  ;;  %3912 = vst [vmem:[#allocation35_spill] sm:$0xff] %v2831_v48 }
  0x61   : > { %631 = vrot.lane.b32.xlu0 %v2753_v15, %s2260_s21 }
  0x64   : > { %637 = vrot.lane.b32.xlu1 %v2761_v5, %s2260_s21 }
  0x65   : > { %635 = vrot.lane.b32.xlu0 %v2766_v27, %s2260_s21 }
  0x68   : > { %641 = vrot.lane.b32.xlu1 %v2774_v17, %s2260_s21 }
  0x69   : > { %639 = vrot.lane.b32.xlu0 %v2779_v36, %s2260_s21 }
  0x6c   : > { %645 = vrot.lane.b32.xlu1 %v2787_v14, %s2260_s21 }
  0x6d   : > { %643 = vrot.lane.b32.xlu0 %v2792_v54, %s2260_s21 }
  0x70   : > { %649 = vrot.lane.b32.xlu1 %v2800_v39, %s2260_s21  ;;  %v591_v39 = vrot.slane %v2599_v9, 2  ;;  %v2844_v9 = vsel %vm542_vm2, %v588_v4, %v589_v52 }
  0x71   : > { %647 = vrot.lane.b32.xlu0 %v2805_v6, %s2260_s21  ;;  %v616_v6 = vrot.slane %v2679_v33, 2  ;;  %v619_v33 = vrot.slane %v2533_v62, 2 }
  0x72   : > { %v2839_v7 = vsel %vm542_vm2, %v589_v52, %v591_v39  ;;  %v599_v39 = vrot.slane %v2470_v45, 2  ;;  %v598_v52 = vrot.slane %v2473_v46, 2 }
  0x74   : > { %653 = vrot.lane.b32.xlu1 %v2813_v61, %s2260_s21  ;;  %v596_v61 = vrot.slane %v2615_v25, 2  ;;  %v2857_v25 = vsel %vm542_vm2, %v593_v38, %v594_v47 }
  0x75   : > { %651 = vrot.lane.b32.xlu0 %v2818_v22, %s2260_s21  ;;  %v611_v22 = vrot.slane %v2663_v3, 2 }
  0x76   : > { %v2852_v26 = vsel %vm542_vm2, %v594_v47, %v596_v61  ;;  %v604_v61 = vrot.slane %v2487_v50, 2  ;;  %v603_v47 = vrot.slane %v2490_v51, 2 }
  0x78   : > { %657 = vrot.lane.b32.xlu1 %v2826_v10, %s2260_s21  ;;  %v601_v10 = vrot.slane %v2631_v35, 2  ;;  %v2870_v35 = vsel %vm542_vm2, %v598_v52, %v599_v39 }
  0x79   : > { %655 = vrot.lane.b32.xlu0 %v2831_v48, %s2260_s21  ;;  %v606_v48 = vrot.slane %v2647_v8, 2  ;;  %v2883_v8 = vsel %vm542_vm2, %v603_v47, %v604_v61  ;;  %v613_v47 = vrot.slane %v2521_v58, 2 }
  0x7a   : > { %v2865_v4 = vsel %vm542_vm2, %v599_v39, %v601_v10  ;;  %v609_v10 = vrot.slane %v2504_v55, 2  ;;  %v608_v39 = vrot.slane %v2511_v56, 2 }
  0x7b   : > { %v2878_v38 = vsel %vm542_vm2, %v604_v61, %v606_v48  ;;  %v614_v48 = vrot.slane %v2518_v57, 2 }
  0x7c   : > { %661 = vrot.lane.b32.xlu1 %v2839_v7, %s2260_s21  ;;  %v2891_v52 = vsel %vm542_vm2, %v609_v10, %v611_v22  ;;  %v2896_v61 = vsel %vm542_vm2, %v608_v39, %v609_v10  ;;  %v621_v10 = vrot.slane %v2695_v34, 2 }
  0x7d   : > { %659 = vrot.lane.b32.xlu0 %v2844_v9, %s2260_s21  ;;  %v2906_v22 = vsel %vm542_vm2, %v614_v48, %v616_v6  ;;  %v2911_v54 = vsel %vm542_vm2, %v613_v47, %v614_v48 }
  0x7e   : > { %v2921_v6 = vsel %vm542_vm2, %v619_v33, %v621_v10 }
  0x80   : > { %665 = vrot.lane.b32.xlu1 %v2852_v26, %s2260_s21 }
  0x81   : > { %663 = vrot.lane.b32.xlu0 %v2857_v25, %s2260_s21 }
  0x84   : > { %669 = vrot.lane.b32.xlu1 %v2865_v4, %s2260_s21 }
  0x85   : > { %667 = vrot.lane.b32.xlu0 %v2870_v35, %s2260_s21 }
  0x88   : > { %673 = vrot.lane.b32.xlu1 %v2878_v38, %s2260_s21 }
  0x89   : > { %671 = vrot.lane.b32.xlu0 %v2883_v8, %s2260_s21 }
  0x8a   : > { %v418_v3 = vpop.permute.xlu1 %417 }
  0x8b   : > { %512 = vst.msk [vmem:[#allocation2 + $0x10] sm:$0xff] %vm509_vm3, %v418_v3  ;;  %v414_v14 = vpop.permute.xlu0 %413  ;;  %v618_v3 = vrot.slane %v2536_v63, 2 }
  0x8c   : > { %510 = vst.msk [vmem:[#allocation2] sm:$0xff] %vm509_vm3, %v414_v14  ;;  %677 = vrot.lane.b32.xlu1 %v2891_v52, %s2260_s21 }
  0x8d   : > { %675 = vrot.lane.b32.xlu0 %v2896_v61, %s2260_s21  ;;  %v2924_v48 = vsel %vm542_vm2, %v618_v3, %v619_v33 }
  0x8e   : > { %v420_v39 = vpop.permute.xlu1 %419 }
  0x8f   : > { %513 = vst.msk [vmem:[#allocation2 + $0x18] sm:$0xff] %vm509_vm3, %v420_v39  ;;  %v416_v14 = vpop.permute.xlu0 %415 }
  0x90   : > { %511 = vst.msk [vmem:[#allocation2 + $0x8] sm:$0xff] %vm509_vm3, %v416_v14  ;;  %681 = vrot.lane.b32.xlu1 %v2906_v22, %s2260_s21 }
  0x91   : > { %679 = vrot.lane.b32.xlu0 %v2911_v54, %s2260_s21 }
  0x92   : > { %v424_v34 = vpop.permute.xlu1 %423 }
  0x93   : > { %515 = vst.msk [vmem:[#allocation2 + $0x28] sm:$0xff] %vm509_vm3, %v424_v34  ;;  %v422_v47 = vpop.permute.xlu0 %421 }
  0x94   : > { %514 = vst.msk [vmem:[#allocation2 + $0x20] sm:$0xff] %vm509_vm3, %v422_v47  ;;  %685 = vrot.lane.b32.xlu1 %v2921_v6, %s2260_s21 }
  0x95   : > { %683 = vrot.lane.b32.xlu0 %v2924_v48, %s2260_s21 }
  0x96   : > { %v428_v39 = vpop.permute.xlu1 %427 }
  0x97   : > { %517 = vst.msk [vmem:[#allocation2 + $0x38] sm:$0xff] %vm509_vm3, %v428_v39  ;;  %v426_v10 = vpop.permute.xlu0 %425 }
  0x98   : > { %516 = vst.msk [vmem:[#allocation2 + $0x30] sm:$0xff] %vm509_vm3, %v426_v10  ;;  %756 = vrot.lane.b32.xlu1 %v2318_v1, %s2261_s22 }
  0x99   : > { %754 = vrot.lane.b32.xlu0 %v2315_v0, %s2261_s22 }
  0x9a   : > { %v432_v33 = vpop.permute.xlu1 %431 }
  0x9b   : > { %519 = vst.msk [vmem:[#allocation2 + $0x48] sm:$0xff] %vm509_vm3, %v432_v33  ;;  %v430_v3 = vpop.permute.xlu0 %429 }
  0x9c   : > { %518 = vst.msk [vmem:[#allocation2 + $0x40] sm:$0xff] %vm509_vm3, %v430_v3  ;;  %760 = vrot.lane.b32.xlu1 %v2344_v11, %s2261_s22 }
  0x9d   : > { %758 = vrot.lane.b32.xlu0 %v2347_v12, %s2261_s22 }
  0x9e   : > { %v436_v14 = vpop.permute.xlu1 %435 }
  0x9f   : > { %521 = vst.msk [vmem:[#allocation2 + $0x58] sm:$0xff] %vm509_vm3, %v436_v14  ;;  %v434_v34 = vpop.permute.xlu0 %433 }
  0xa0   : > { %520 = vst.msk [vmem:[#allocation2 + $0x50] sm:$0xff] %vm509_vm3, %v434_v34  ;;  %764 = vrot.lane.b32.xlu1 %v2359_v16, %s2261_s22 }
  0xa1   : > { %762 = vrot.lane.b32.xlu0 %v2369_v18, %s2261_s22 }
  0xa2   : > { %v440_v0 = vpop.permute.xlu1 %439 }
  0xa3   : > { %523 = vst.msk [vmem:[#allocation2 + $0x68] sm:$0xff] %vm509_vm3, %v440_v0  ;;  %v438_v1 = vpop.permute.xlu0 %437 }
  0xa4   : > { %522 = vst.msk [vmem:[#allocation2 + $0x60] sm:$0xff] %vm509_vm3, %v438_v1  ;;  %768 = vrot.lane.b32.xlu1 %v2372_v19, %s2261_s22 }
  0xa5   : > { %766 = vrot.lane.b32.xlu0 %v2383_v23, %s2261_s22 }
  0xa6   : > { %v444_v47 = vpop.permute.xlu1 %443 }
  0xa7   : > { %525 = vst.msk [vmem:[#allocation2 + $0x78] sm:$0xff] %vm509_vm3, %v444_v47  ;;  %v442_v39 = vpop.permute.xlu0 %441 }
  0xa8   : > { %524 = vst.msk [vmem:[#allocation2 + $0x70] sm:$0xff] %vm509_vm3, %v442_v39  ;;  %772 = vrot.lane.b32.xlu1 %v2386_v24, %s2261_s22 }
  0xa9   : > { %770 = vrot.lane.b32.xlu0 %v2398_v28, %s2261_s22 }
  0xaa   : > { %v448_v10 = vpop.permute.xlu1 %447 }
  0xab   : > { %527 = vst.msk [vmem:[#allocation2 + $0x88] sm:$0xff] %vm509_vm3, %v448_v10  ;;  %v446_v33 = vpop.permute.xlu0 %445 }
  0xac   : > { %526 = vst.msk [vmem:[#allocation2 + $0x80] sm:$0xff] %vm509_vm3, %v446_v33  ;;  %776 = vrot.lane.b32.xlu1 %v2405_v29, %s2261_s22 }
  0xad   : > { %774 = vrot.lane.b32.xlu0 %v2408_v30, %s2261_s22 }
  0xae   : > { %v452_v3 = vpop.permute.xlu1 %451 }
  0xaf   : > { %529 = vst.msk [vmem:[#allocation2 + $0x98] sm:$0xff] %vm509_vm3, %v452_v3  ;;  %v450_v14 = vpop.permute.xlu0 %449 }
  0xb0   : > { %528 = vst.msk [vmem:[#allocation2 + $0x90] sm:$0xff] %vm509_vm3, %v450_v14  ;;  %780 = vrot.lane.b32.xlu1 %v2415_v31, %s2261_s22 }
  0xb1   : > { %778 = vrot.lane.b32.xlu0 %v2418_v32, %s2261_s22 }
  0xb2   : > { %v456_v34 = vpop.permute.xlu1 %455 }
  0xb3   : > { %531 = vst.msk [vmem:[#allocation2 + $0xa8] sm:$0xff] %vm509_vm3, %v456_v34  ;;  %v454_v0 = vpop.permute.xlu0 %453 }
  0xb4   : > { %530 = vst.msk [vmem:[#allocation2 + $0xa0] sm:$0xff] %vm509_vm3, %v454_v0  ;;  %784 = vrot.lane.b32.xlu1 %v2434_v37, %s2261_s22 }
  0xb5   : > { %782 = vrot.lane.b32.xlu0 %v2445_v40, %s2261_s22 }
  0xb6   : > { %v460_v1 = vpop.permute.xlu1 %459 }
  0xb7   : > { %533 = vst.msk [vmem:[#allocation2 + $0xb8] sm:$0xff] %vm509_vm3, %v460_v1  ;;  %v458_v47 = vpop.permute.xlu0 %457 }
  0xb8   : > { %532 = vst.msk [vmem:[#allocation2 + $0xb0] sm:$0xff] %vm509_vm3, %v458_v47  ;;  %788 = vrot.lane.b32.xlu1 %v2448_v41, %s2261_s22 }
  0xb9   : > { %786 = vrot.lane.b32.xlu0 %v2451_v42, %s2261_s22 }
  0xba   : > { %v464_v39 = vpop.permute.xlu1 %463 }
  0xbb   : > { %535 = vst.msk [vmem:[#allocation2 + $0xc8] sm:$0xff] %vm509_vm3, %v464_v39  ;;  %v462_v10 = vpop.permute.xlu0 %461 }
  0xbc   : > { %534 = vst.msk [vmem:[#allocation2 + $0xc0] sm:$0xff] %vm509_vm3, %v462_v10  ;;  %792 = vrot.lane.b32.xlu1 %v2456_v43, %s2261_s22 }
  0xbd   : > { %790 = vrot.lane.b32.xlu0 %v2459_v44, %s2261_s22 }
  0xbe   : > { %v468_v33 = vpop.permute.xlu1 %467 }
  0xbf   : > { %537 = vst.msk [vmem:[#allocation2 + $0xd8] sm:$0xff] %vm509_vm3, %v468_v33  ;;  %v466_v3 = vpop.permute.xlu0 %465 }
  0xc0   : > { %536 = vst.msk [vmem:[#allocation2 + $0xd0] sm:$0xff] %vm509_vm3, %v466_v3  ;;  %796 = vrot.lane.b32.xlu1 %v2470_v45, %s2261_s22  ;;  %v3023_v3 = vld [vmem:[%s2312_s19 + $0x188] sm:$0xff] }
  0xc1   : > { %794 = vrot.lane.b32.xlu0 %v2473_v46, %s2261_s22 }
  0xc2   : > { %v472_v14 = vpop.permute.xlu1 %471 }
  0xc3   : > { %539 = vst.msk [vmem:[#allocation2 + $0xe8] sm:$0xff] %vm509_vm3, %v472_v14  ;;  %v470_v34 = vpop.permute.xlu0 %469 }
  0xc4   : > { %538 = vst.msk [vmem:[#allocation2 + $0xe0] sm:$0xff] %vm509_vm3, %v470_v34  ;;  %800 = vrot.lane.b32.xlu1 %v2487_v50, %s2261_s22  ;;  %v3026_v34 = vld [vmem:[%s2312_s19 + $0x180] sm:$0xff] }
  0xc5   : > { %798 = vrot.lane.b32.xlu0 %v2490_v51, %s2261_s22 }
  0xc6   : > { %v476_v0 = vpop.permute.xlu1 %475 }
  0xc7   : > { %541 = vst.msk [vmem:[#allocation2 + $0xf8] sm:$0xff] %vm509_vm3, %v476_v0  ;;  %v474_v1 = vpop.permute.xlu0 %473 }
  0xc8   : > { %540 = vst.msk [vmem:[#allocation2 + $0xf0] sm:$0xff] %vm509_vm3, %v474_v1  ;;  %804 = vrot.lane.b32.xlu1 %v2504_v55, %s2261_s22 }
  0xc9   : > { %802 = vrot.lane.b32.xlu0 %v2511_v56, %s2261_s22 }
  0xca   : > { %v626_v47 = vpop.permute.xlu1 %625 }
  0xcb   : > { %721 = vst.msk [vmem:[#allocation2 + $0x8] sm:$0xff] %vm719_vm4, %v626_v47  ;;  %v624_v39 = vpop.permute.xlu0 %623 }
  0xcc   : > { %720 = vst.msk [vmem:[#allocation2] sm:$0xff] %vm719_vm4, %v624_v39  ;;  %808 = vrot.lane.b32.xlu1 %v2518_v57, %s2261_s22 }
  0xcd   : > { %806 = vrot.lane.b32.xlu0 %v2521_v58, %s2261_s22 }
  0xce   : > { %v630_v10 = vpop.permute.xlu1 %629 }
  0xcf   : > { %723 = vst.msk [vmem:[#allocation2 + $0x18] sm:$0xff] %vm719_vm4, %v630_v10  ;;  %v628_v33 = vpop.permute.xlu0 %627 }
  0xd0   : > { %722 = vst.msk [vmem:[#allocation2 + $0x10] sm:$0xff] %vm719_vm4, %v628_v33  ;;  %812 = vrot.lane.b32.xlu1 %v2533_v62, %s2261_s22 }
  0xd1   : > { %810 = vrot.lane.b32.xlu0 %v2536_v63, %s2261_s22 }
  0xd2   : > { %v634_v14 = vpop.permute.xlu1 %633 }
  0xd3   : > { %725 = vst.msk [vmem:[#allocation2 + $0x28] sm:$0xff] %vm719_vm4, %v634_v14  ;;  %v632_v0 = vpop.permute.xlu0 %631 }
  0xd4   : > { %724 = vst.msk [vmem:[#allocation2 + $0x20] sm:$0xff] %vm719_vm4, %v632_v0  ;;  %816 = vrot.lane.b32.xlu1 %v3023_v3, %s2261_s22 }
  0xd5   : > { %814 = vrot.lane.b32.xlu0 %v3026_v34, %s2261_s22 }
  0xd6   : > { %v638_v1 = vpop.permute.xlu1 %637 }
  0xd7   : > { %727 = vst.msk [vmem:[#allocation2 + $0x38] sm:$0xff] %vm719_vm4, %v638_v1  ;;  %v636_v47 = vpop.permute.xlu0 %635 }
  0xd8   : > { %726 = vst.msk [vmem:[#allocation2 + $0x30] sm:$0xff] %vm719_vm4, %v636_v47  ;;  %891 = vrot.lane.b32.xlu1 %v2378_v20, %s2262_s23 }
  0xd9   : > { %889 = vrot.lane.b32.xlu0 %v2352_v13, %s2262_s23 }
  0xda   : > { %v642_v39 = vpop.permute.xlu1 %641 }
  0xdb   : > { %729 = vst.msk [vmem:[#allocation2 + $0x48] sm:$0xff] %vm719_vm4, %v642_v39  ;;  %v640_v10 = vpop.permute.xlu0 %639 }
  0xdc   : > { %728 = vst.msk [vmem:[#allocation2 + $0x40] sm:$0xff] %vm719_vm4, %v640_v10  ;;  %923 = vrot.lane.b32.xlu1 %v2622_v60, %s2262_s23 }
  0xdd   : > { %921 = vrot.lane.b32.xlu0 %v2627_v53, %s2262_s23 }
  0xde   : > { %v646_v33 = vpop.permute.xlu1 %645 }
  0xdf   : > { %731 = vst.msk [vmem:[#allocation2 + $0x58] sm:$0xff] %vm719_vm4, %v646_v33  ;;  %v644_v14 = vpop.permute.xlu0 %643  ;;  %v3914_v33 = vld [vmem:[#allocation17_spill] sm:$0xff] }
  0xe0   : > { %730 = vst.msk [vmem:[#allocation2 + $0x50] sm:$0xff] %vm719_vm4, %v644_v14  ;;  %1055 = vrot.lane.b32.xlu1 %v2844_v9, %s2263_s24  ;;  %v3915_v14 = vld [vmem:[#allocation3_spill] sm:$0xff] }
  0xe1   : > { %1023 = vrot.lane.b32.xlu0 %v2740_v59, %s2263_s24 }
  0xe2   : > { %v650_v13 = vpop.permute.xlu1 %649 }
  0xe3   : > { %733 = vst.msk [vmem:[#allocation2 + $0x68] sm:$0xff] %vm719_vm4, %v650_v13  ;;  %v648_v20 = vpop.permute.xlu0 %647 }
  0xe4   : > { %732 = vst.msk [vmem:[#allocation2 + $0x60] sm:$0xff] %vm719_vm4, %v648_v20  ;;  %1057 = vrot.lane.b32.xlu1 %v2839_v7, %s2263_s24 }
  0xe5   : > { %1025 = vrot.lane.b32.xlu0 %v2735_v2, %s2263_s24 }
  0xe6   : > { %v654_v0 = vpop.permute.xlu1 %653 }
  0xe7   : > { %735 = vst.msk [vmem:[#allocation2 + $0x78] sm:$0xff] %vm719_vm4, %v654_v0  ;;  %v652_v1 = vpop.permute.xlu0 %651 }
  0xe8   : > { %734 = vst.msk [vmem:[#allocation2 + $0x70] sm:$0xff] %vm719_vm4, %v652_v1  ;;  %1186 = vrot.lane.b32.xlu1 %v2459_v44, %s2264_s25 }
  0xe9   : > { %1154 = vrot.lane.b32.xlu0 %v2347_v12, %s2264_s25  ;;  %v3913_v12 = vld [vmem:[#allocation4_spill] sm:$0xff] }
  0xea   : > { %v658_v59 = vpop.permute.xlu1 %657 }
  0xeb   : > { %737 = vst.msk [vmem:[#allocation2 + $0x88] sm:$0xff] %vm719_vm4, %v658_v59  ;;  %v656_v47 = vpop.permute.xlu0 %655 }
  0xec   : > { %736 = vst.msk [vmem:[#allocation2 + $0x80] sm:$0xff] %vm719_vm4, %v656_v47  ;;  %1188 = vrot.lane.b32.xlu1 %v2456_v43, %s2264_s25 }
  0xed   : > { %1156 = vrot.lane.b32.xlu0 %v2344_v11, %s2264_s25 }
  0xee   : > { %v662_v2 = vpop.permute.xlu1 %661 }
  0xef   : > { %739 = vst.msk [vmem:[#allocation2 + $0x98] sm:$0xff] %vm719_vm4, %v662_v2  ;;  %v660_v39 = vpop.permute.xlu0 %659 }
  0xf0   : > { %738 = vst.msk [vmem:[#allocation2 + $0x90] sm:$0xff] %vm719_vm4, %v660_v39  ;;  %1321 = vrot.lane.b32.xlu1 %v2643_v21, %s2265_s26 }
  0xf1   : > { %1289 = vrot.lane.b32.xlu0 %v3913_v12, %s2265_s26 }
  0xf2   : > { %v666_v44 = vpop.permute.xlu1 %665 }
  0xf3   : > { %741 = vst.msk [vmem:[#allocation2 + $0xa8] sm:$0xff] %vm719_vm4, %v666_v44  ;;  %v664_v43 = vpop.permute.xlu0 %663 }
  0xf4   : > { %740 = vst.msk [vmem:[#allocation2 + $0xa0] sm:$0xff] %vm719_vm4, %v664_v43  ;;  %925 = vrot.lane.b32.xlu1 %v2643_v21, %s2262_s23 }
  0xf5   : > { %893 = vrot.lane.b32.xlu0 %v3913_v12, %s2262_s23 }
  0xf6   : > { %v670_v11 = vpop.permute.xlu1 %669 }
  0xf7   : > { %743 = vst.msk [vmem:[#allocation2 + $0xb8] sm:$0xff] %vm719_vm4, %v670_v11  ;;  %v668_v10 = vpop.permute.xlu0 %667 }
  0xf8   : > { %742 = vst.msk [vmem:[#allocation2 + $0xb0] sm:$0xff] %vm719_vm4, %v668_v10  ;;  %1323 = vrot.lane.b32.xlu1 %v3914_v33, %s2265_s26 }
  0xf9   : > { %1291 = vrot.lane.b32.xlu0 %v3915_v14, %s2265_s26 }
  0xfa   : > { %v674_v13 = vpop.permute.xlu1 %673 }
  0xfb   : > { %745 = vst.msk [vmem:[#allocation2 + $0xc8] sm:$0xff] %vm719_vm4, %v674_v13  ;;  %v672_v20 = vpop.permute.xlu0 %671 }
  0xfc   : > { %744 = vst.msk [vmem:[#allocation2 + $0xc0] sm:$0xff] %vm719_vm4, %v672_v20  ;;  %1455 = vrot.lane.b32.xlu1 %v2857_v25, %s2266_s27 }
  0xfd   : > { %1423 = vrot.lane.b32.xlu0 %v2753_v15, %s2266_s27 }
  0xfe   : > { %v678_v21 = vpop.permute.xlu1 %677 }
  0xff   : > { %747 = vst.msk [vmem:[#allocation2 + $0xd8] sm:$0xff] %vm719_vm4, %v678_v21  ;;  %v676_v0 = vpop.permute.xlu0 %675 }
 0x100   : > { %746 = vst.msk [vmem:[#allocation2 + $0xd0] sm:$0xff] %vm719_vm4, %v676_v0  ;;  %927 = vrot.lane.b32.xlu1 %v3914_v33, %s2262_s23  ;;  %v3918_v33 = vld [vmem:[#allocation18_spill] sm:$0xff] }
 0x101   : > { %895 = vrot.lane.b32.xlu0 %v3915_v14, %s2262_s23  ;;  %v3919_v14 = vld [vmem:[#allocation5_spill] sm:$0xff] }
 0x102   : > { %v682_v1 = vpop.permute.xlu1 %681 }
 0x103   : > { %749 = vst.msk [vmem:[#allocation2 + $0xe8] sm:$0xff] %vm719_vm4, %v682_v1  ;;  %v680_v59 = vpop.permute.xlu0 %679 }
 0x104   : > { %748 = vst.msk [vmem:[#allocation2 + $0xe0] sm:$0xff] %vm719_vm4, %v680_v59  ;;  %1059 = vrot.lane.b32.xlu1 %v2857_v25, %s2263_s24 }
 0x105   : > { %1027 = vrot.lane.b32.xlu0 %v2753_v15, %s2263_s24 }
 0x106   : > { %v686_v47 = vpop.permute.xlu1 %685 }
 0x107   : > { %751 = vst.msk [vmem:[#allocation2 + $0xf8] sm:$0xff] %vm719_vm4, %v686_v47  ;;  %v684_v2 = vpop.permute.xlu0 %683 }
 0x108   : > { %750 = vst.msk [vmem:[#allocation2 + $0xf0] sm:$0xff] %vm719_vm4, %v684_v2  ;;  %1457 = vrot.lane.b32.xlu1 %v2852_v26, %s2266_s27 }
 0x109   : > { %1425 = vrot.lane.b32.xlu0 %v2748_v49, %s2266_s27 }
 0x10a   : > { %v757_v39 = vpop.permute.xlu1 %756 }
 0x10b   : > { %852 = vst.msk [vmem:[#allocation2 + $0x8] sm:$0xff] %vm850_vm5, %v757_v39  ;;  %v755_v25 = vpop.permute.xlu0 %754 }
 0x10c   : > { %851 = vst.msk [vmem:[#allocation2] sm:$0xff] %vm850_vm5, %v755_v25  ;;  %1061 = vrot.lane.b32.xlu1 %v2852_v26, %s2263_s24 }
 0x10d   : > { %1029 = vrot.lane.b32.xlu0 %v2748_v49, %s2263_s24 }
 0x10e   : > { %v761_v15 = vpop.permute.xlu1 %760 }
 0x10f   : > { %854 = vst.msk [vmem:[#allocation2 + $0x18] sm:$0xff] %vm850_vm5, %v761_v15  ;;  %v759_v12 = vpop.permute.xlu0 %758 }
 0x110   : > { %853 = vst.msk [vmem:[#allocation2 + $0x10] sm:$0xff] %vm850_vm5, %v759_v12  ;;  %1190 = vrot.lane.b32.xlu1 %v2473_v46, %s2264_s25  ;;  %v3917_v46 = vld [vmem:[#allocation6_spill] sm:$0xff] }
 0x111   : > { %1158 = vrot.lane.b32.xlu0 %v2369_v18, %s2264_s25  ;;  %v3916_v18 = vld [vmem:[#allocation19_spill] sm:$0xff] }
 0x112   : > { %v765_v44 = vpop.permute.xlu1 %764 }
 0x113   : > { %856 = vst.msk [vmem:[#allocation2 + $0x28] sm:$0xff] %vm850_vm5, %v765_v44  ;;  %v763_v43 = vpop.permute.xlu0 %762 }
 0x114   : > { %855 = vst.msk [vmem:[#allocation2 + $0x20] sm:$0xff] %vm850_vm5, %v763_v43  ;;  %1192 = vrot.lane.b32.xlu1 %v2470_v45, %s2264_s25 }
 0x115   : > { %1160 = vrot.lane.b32.xlu0 %v2359_v16, %s2264_s25 }
 0x116   : > { %v769_v49 = vpop.permute.xlu1 %768 }
 0x117   : > { %858 = vst.msk [vmem:[#allocation2 + $0x38] sm:$0xff] %vm850_vm5, %v769_v49  ;;  %v767_v26 = vpop.permute.xlu0 %766  ;;  %v3922_v49 = vld [vmem:[#allocation20_spill] sm:$0xff] }
 0x118   : > { %857 = vst.msk [vmem:[#allocation2 + $0x30] sm:$0xff] %vm850_vm5, %v767_v26  ;;  %1325 = vrot.lane.b32.xlu1 %v3916_v18, %s2265_s26  ;;  %v3923_v26 = vld [vmem:[#allocation7_spill] sm:$0xff] }
 0x119   : > { %1293 = vrot.lane.b32.xlu0 %v3917_v46, %s2265_s26 }
 0x11a   : > { %v773_v11 = vpop.permute.xlu1 %772 }
 0x11b   : > { %860 = vst.msk [vmem:[#allocation2 + $0x48] sm:$0xff] %vm850_vm5, %v773_v11  ;;  %v771_v10 = vpop.permute.xlu0 %770 }
 0x11c   : > { %859 = vst.msk [vmem:[#allocation2 + $0x40] sm:$0xff] %vm850_vm5, %v771_v10  ;;  %929 = vrot.lane.b32.xlu1 %v3916_v18, %s2262_s23 }
 0x11d   : > { %897 = vrot.lane.b32.xlu0 %v3917_v46, %s2262_s23 }
 0x11e   : > { %v777_v16 = vpop.permute.xlu1 %776 }
 0x11f   : > { %862 = vst.msk [vmem:[#allocation2 + $0x58] sm:$0xff] %vm850_vm5, %v777_v16  ;;  %v775_v45 = vpop.permute.xlu0 %774 }
 0x120   : > { %861 = vst.msk [vmem:[#allocation2 + $0x50] sm:$0xff] %vm850_vm5, %v775_v45  ;;  %1327 = vrot.lane.b32.xlu1 %v3918_v33, %s2265_s26 }
 0x121   : > { %1295 = vrot.lane.b32.xlu0 %v3919_v14, %s2265_s26 }
 0x122   : > { %v781_v13 = vpop.permute.xlu1 %780 }
 0x123   : > { %864 = vst.msk [vmem:[#allocation2 + $0x68] sm:$0xff] %vm850_vm5, %v781_v13  ;;  %v779_v20 = vpop.permute.xlu0 %778 }
 0x124   : > { %863 = vst.msk [vmem:[#allocation2 + $0x60] sm:$0xff] %vm850_vm5, %v779_v20  ;;  %1459 = vrot.lane.b32.xlu1 %v2870_v35, %s2266_s27 }
 0x125   : > { %1427 = vrot.lane.b32.xlu0 %v2766_v27, %s2266_s27 }
 0x126   : > { %v785_v21 = vpop.permute.xlu1 %784 }
 0x127   : > { %866 = vst.msk [vmem:[#allocation2 + $0x78] sm:$0xff] %vm850_vm5, %v785_v21  ;;  %v783_v0 = vpop.permute.xlu0 %782 }
 0x128   : > { %865 = vst.msk [vmem:[#allocation2 + $0x70] sm:$0xff] %vm850_vm5, %v783_v0  ;;  %931 = vrot.lane.b32.xlu1 %v3918_v33, %s2262_s23  ;;  %v3925_v0 = vld [vmem:[#allocation10_spill] sm:$0xff] }
 0x129   : > { %899 = vrot.lane.b32.xlu0 %v3919_v14, %s2262_s23 }
 0x12a   : > { %v789_v1 = vpop.permute.xlu1 %788 }
 0x12b   : > { %868 = vst.msk [vmem:[#allocation2 + $0x88] sm:$0xff] %vm850_vm5, %v789_v1  ;;  %v787_v59 = vpop.permute.xlu0 %786 }
 0x12c   : > { %867 = vst.msk [vmem:[#allocation2 + $0x80] sm:$0xff] %vm850_vm5, %v787_v59  ;;  %1063 = vrot.lane.b32.xlu1 %v2870_v35, %s2263_s24 }
 0x12d   : > { %1031 = vrot.lane.b32.xlu0 %v2766_v27, %s2263_s24 }
 0x12e   : > { %v793_v47 = vpop.permute.xlu1 %792 }
 0x12f   : > { %870 = vst.msk [vmem:[#allocation2 + $0x98] sm:$0xff] %vm850_vm5, %v793_v47  ;;  %v791_v2 = vpop.permute.xlu0 %790  ;;  %v2267_v47 = vmov 0.0  }
 0x130   : > { %869 = vst.msk [vmem:[#allocation2 + $0x90] sm:$0xff] %vm850_vm5, %v791_v2  ;;  %1461 = vrot.lane.b32.xlu1 %v2865_v4, %s2266_s27  ;;  %v3926_v2 = vld [vmem:[#allocation22_spill] sm:$0xff] }
 0x131   : > { %1429 = vrot.lane.b32.xlu0 %v2761_v5, %s2266_s27 }
 0x132   : > { %v797_v39 = vpop.permute.xlu1 %796 }
 0x133   : > { %872 = vst.msk [vmem:[#allocation2 + $0xa8] sm:$0xff] %vm850_vm5, %v797_v39  ;;  %v795_v25 = vpop.permute.xlu0 %794  ;;  %v3927_v39 = vld [vmem:[#allocation9_spill] sm:$0xff] }
 0x134   : > { %871 = vst.msk [vmem:[#allocation2 + $0xa0] sm:$0xff] %vm850_vm5, %v795_v25  ;;  %1065 = vrot.lane.b32.xlu1 %v2865_v4, %s2263_s24 }
 0x135   : > { %1033 = vrot.lane.b32.xlu0 %v2761_v5, %s2263_s24 }
 0x136   : > { %v801_v27 = vpop.permute.xlu1 %800 }
 0x137   : > { %874 = vst.msk [vmem:[#allocation2 + $0xb8] sm:$0xff] %vm850_vm5, %v801_v27  ;;  %v799_v35 = vpop.permute.xlu0 %798 }
 0x138   : > { %873 = vst.msk [vmem:[#allocation2 + $0xb0] sm:$0xff] %vm850_vm5, %v799_v35  ;;  %1194 = vrot.lane.b32.xlu1 %v2490_v51, %s2264_s25  ;;  %v3921_v51 = vld [vmem:[#allocation8_spill] sm:$0xff]  ;;  %v3928_v35 = vld [vmem:[#allocation29_spill] sm:$0xff] }
 0x139   : > { %1162 = vrot.lane.b32.xlu0 %v2383_v23, %s2264_s25  ;;  %v3920_v23 = vld [vmem:[#allocation21_spill] sm:$0xff] }
 0x13a   : > { %v805_v15 = vpop.permute.xlu1 %804 }
 0x13b   : > { %876 = vst.msk [vmem:[#allocation2 + $0xc8] sm:$0xff] %vm850_vm5, %v805_v15  ;;  %v803_v12 = vpop.permute.xlu0 %802 }
 0x13c   : > { %875 = vst.msk [vmem:[#allocation2 + $0xc0] sm:$0xff] %vm850_vm5, %v803_v12  ;;  %1196 = vrot.lane.b32.xlu1 %v2487_v50, %s2264_s25 }
 0x13d   : > { %1164 = vrot.lane.b32.xlu0 %v2372_v19, %s2264_s25 }
 0x13e   : > { %v809_v5 = vpop.permute.xlu1 %808 }
 0x13f   : > { %878 = vst.msk [vmem:[#allocation2 + $0xd8] sm:$0xff] %vm850_vm5, %v809_v5  ;;  %v807_v4 = vpop.permute.xlu0 %806 }
 0x140   : > { %877 = vst.msk [vmem:[#allocation2 + $0xd0] sm:$0xff] %vm850_vm5, %v807_v4  ;;  %1329 = vrot.lane.b32.xlu1 %v3920_v23, %s2265_s26 }
 0x141   : > { %1297 = vrot.lane.b32.xlu0 %v3921_v51, %s2265_s26 }
 0x142   : > { %v813_v44 = vpop.permute.xlu1 %812 }
 0x143   : > { %880 = vst.msk [vmem:[#allocation2 + $0xe8] sm:$0xff] %vm850_vm5, %v813_v44  ;;  %v811_v43 = vpop.permute.xlu0 %810  ;;  %v3929_v44 = vld [vmem:[#allocation28_spill] sm:$0xff] }
 0x144   : > { %879 = vst.msk [vmem:[#allocation2 + $0xe0] sm:$0xff] %vm850_vm5, %v811_v43  ;;  %933 = vrot.lane.b32.xlu1 %v3920_v23, %s2262_s23 }
 0x145   : > { %901 = vrot.lane.b32.xlu0 %v3921_v51, %s2262_s23 }
 0x146   : > { %v817_v19 = vpop.permute.xlu1 %816 }
 0x147   : > { %882 = vst.msk [vmem:[#allocation2 + $0xf8] sm:$0xff] %vm850_vm5, %v817_v19  ;;  %v815_v50 = vpop.permute.xlu0 %814 }
 0x148   : > { %881 = vst.msk [vmem:[#allocation2 + $0xf0] sm:$0xff] %vm850_vm5, %v815_v50  ;;  %1331 = vrot.lane.b32.xlu1 %v3922_v49, %s2265_s26 }
 0x149   : > { %1299 = vrot.lane.b32.xlu0 %v3923_v26, %s2265_s26 }
 0x14a   : > { %v892_v18 = vpop.permute.xlu1 %891 }
 0x14b   : > { %987 = vst.msk [vmem:[#allocation2 + $0x8] sm:$0xff] %vm985_vm6, %v892_v18  ;;  %v890_v46 = vpop.permute.xlu0 %889 }
 0x14c   : > { %986 = vst.msk [vmem:[#allocation2] sm:$0xff] %vm985_vm6, %v890_v46  ;;  %1463 = vrot.lane.b32.xlu1 %v2883_v8, %s2266_s27 }
 0x14d   : > { %1431 = vrot.lane.b32.xlu0 %v2779_v36, %s2266_s27 }
 0x14e   : > { %v924_v11 = vpop.permute.xlu1 %923 }
 0x14f   : > { %1003 = vst.msk [vmem:[#allocation2 + $0x88] sm:$0xff] %vm985_vm6, %v924_v11  ;;  %v922_v10 = vpop.permute.xlu0 %921 }
 0x150   : > { %1002 = vst.msk [vmem:[#allocation2 + $0x80] sm:$0xff] %vm985_vm6, %v922_v10  ;;  %935 = vrot.lane.b32.xlu1 %v3922_v49, %s2262_s23  ;;  %v3932_v10 = vld [vmem:[#allocation24_spill] sm:$0xff] }
 0x151   : > { %903 = vrot.lane.b32.xlu0 %v3923_v26, %s2262_s23 }
 0x152   : > { %v1056_v16 = vpop.permute.xlu1 %1055 }
 0x153   : > { %1136 = vst.msk [vmem:[#allocation2 + $0x80] sm:$0xff] %vm1119_vm7, %v1056_v16  ;;  %v1024_v45 = vpop.permute.xlu0 %1023  ;;  %v3933_v16 = vld [vmem:[#allocation11_spill] sm:$0xff] }
 0x154   : > { %1120 = vst.msk [vmem:[#allocation2] sm:$0xff] %vm1119_vm7, %v1024_v45  ;;  %1067 = vrot.lane.b32.xlu1 %v2883_v8, %s2263_s24 }
 0x155   : > { %1035 = vrot.lane.b32.xlu0 %v2779_v36, %s2263_s24 }
 0x156   : > { %v1058_v33 = vpop.permute.xlu1 %1057 }
 0x157   : > { %1137 = vst.msk [vmem:[#allocation2 + $0x88] sm:$0xff] %vm1119_vm7, %v1058_v33  ;;  %v1026_v14 = vpop.permute.xlu0 %1025 }
 0x158   : > { %1121 = vst.msk [vmem:[#allocation2 + $0x8] sm:$0xff] %vm1119_vm7, %v1026_v14  ;;  %1465 = vrot.lane.b32.xlu1 %v2878_v38, %s2266_s27  ;;  %v3934_v14 = vld [vmem:[#allocation31_spill] sm:$0xff] }
 0x159   : > { %1433 = vrot.lane.b32.xlu0 %v2774_v17, %s2266_s27 }
 0x15a   : > { %v1187_v13 = vpop.permute.xlu1 %1186 }
 0x15b   : > { %1267 = vst.msk [vmem:[#allocation2 + $0x80] sm:$0xff] %vm1250_vm8, %v1187_v13  ;;  %v1155_v8 = vpop.permute.xlu0 %1154 }
 0x15c   : > { %1251 = vst.msk [vmem:[#allocation2] sm:$0xff] %vm1250_vm8, %v1155_v8  ;;  %1069 = vrot.lane.b32.xlu1 %v2878_v38, %s2263_s24 }
 0x15d   : > { %1037 = vrot.lane.b32.xlu0 %v2774_v17, %s2263_s24 }
 0x15e   : > { %v1189_v36 = vpop.permute.xlu1 %1188 }
 0x15f   : > { %1268 = vst.msk [vmem:[#allocation2 + $0x88] sm:$0xff] %vm1250_vm8, %v1189_v36  ;;  %v1157_v20 = vpop.permute.xlu0 %1156 }
 0x160   : > { %1252 = vst.msk [vmem:[#allocation2 + $0x8] sm:$0xff] %vm1250_vm8, %v1157_v20  ;;  %1198 = vrot.lane.b32.xlu1 %v2511_v56, %s2264_s25 }
 0x161   : > { %1166 = vrot.lane.b32.xlu0 %v2398_v28, %s2264_s25  ;;  %v3924_v28 = vld [vmem:[#allocation23_spill] sm:$0xff] }
 0x162   : > { %v1322_v21 = vpop.permute.xlu1 %1321 }
 0x163   : > { %1402 = vst.msk [vmem:[#allocation2 + $0x80] sm:$0xff] %vm1385_vm9, %v1322_v21  ;;  %v1290_v38 = vpop.permute.xlu0 %1289 }
 0x164   : > { %1386 = vst.msk [vmem:[#allocation2] sm:$0xff] %vm1385_vm9, %v1290_v38  ;;  %1200 = vrot.lane.b32.xlu1 %v2504_v55, %s2264_s25 }
 0x165   : > { %1168 = vrot.lane.b32.xlu0 %v2386_v24, %s2264_s25 }
 0x166   : > { %v926_v17 = vpop.permute.xlu1 %925 }
 0x167   : > { %1004 = vst.msk [vmem:[#allocation2 + $0x90] sm:$0xff] %vm985_vm6, %v926_v17  ;;  %v894_v56 = vpop.permute.xlu0 %893  ;;  %v3935_v17 = vld [vmem:[#allocation30_spill] sm:$0xff] }
 0x168   : > { %988 = vst.msk [vmem:[#allocation2 + $0x10] sm:$0xff] %vm985_vm6, %v894_v56  ;;  %1333 = vrot.lane.b32.xlu1 %v3924_v28, %s2265_s26 }
 0x169   : > { %1301 = vrot.lane.b32.xlu0 %v3925_v0, %s2265_s26 }
 0x16a   : > { %v1324_v1 = vpop.permute.xlu1 %1323 }
 0x16b   : > { %1403 = vst.msk [vmem:[#allocation2 + $0x88] sm:$0xff] %vm1385_vm9, %v1324_v1  ;;  %v1292_v59 = vpop.permute.xlu0 %1291 }
 0x16c   : > { %1387 = vst.msk [vmem:[#allocation2 + $0x8] sm:$0xff] %vm1385_vm9, %v1292_v59  ;;  %937 = vrot.lane.b32.xlu1 %v3924_v28, %s2262_s23 }
 0x16d   : > { %905 = vrot.lane.b32.xlu0 %v3925_v0, %s2262_s23 }
 0x16e   : > { %v1456_v24 = vpop.permute.xlu1 %1455 }
 0x16f   : > { %1536 = vst.msk [vmem:[#allocation2 + $0x80] sm:$0xff] %vm1519_vm10, %v1456_v24  ;;  %v1424_v55 = vpop.permute.xlu0 %1423 }
 0x170   : > { %1569 = vst.msk [vmem:[#allocation2 + $0x80] sm:$0xff] %vm1552_vm11, %v2267_v47  ;;  %1335 = vrot.lane.b32.xlu1 %v3926_v2, %s2265_s26 }
 0x171   : > { %1520 = vst.msk [vmem:[#allocation2] sm:$0xff] %vm1519_vm10, %v1424_v55  ;;  %1303 = vrot.lane.b32.xlu0 %v3927_v39, %s2265_s26 }
 0x172   : > { %1553 = vst.msk [vmem:[#allocation2] sm:$0xff] %vm1552_vm11, %v2267_v47  ;;  %v928_v25 = vpop.permute.xlu1 %927 }
 0x173   : > { %1005 = vst.msk [vmem:[#allocation2 + $0x98] sm:$0xff] %vm985_vm6, %v928_v25  ;;  %v896_v27 = vpop.permute.xlu0 %895  ;;  %v3939_v25 = vld [vmem:[#allocation13_spill] sm:$0xff] }
 0x174   : > { %989 = vst.msk [vmem:[#allocation2 + $0x18] sm:$0xff] %vm985_vm6, %v896_v27  ;;  %1467 = vrot.lane.b32.xlu1 %v2896_v61, %s2266_s27 }
 0x175   : > { %1435 = vrot.lane.b32.xlu0 %v3928_v35, %s2266_s27 }
 0x176   : > { %v1060_v15 = vpop.permute.xlu1 %1059 }
 0x177   : > { %1138 = vst.msk [vmem:[#allocation2 + $0x90] sm:$0xff] %vm1119_vm7, %v1060_v15  ;;  %v1028_v12 = vpop.permute.xlu0 %1027  ;;  %v3940_v15 = vld [vmem:[#allocation33_spill] sm:$0xff] }
 0x178   : > { %1122 = vst.msk [vmem:[#allocation2 + $0x10] sm:$0xff] %vm1119_vm7, %v1028_v12  ;;  %939 = vrot.lane.b32.xlu1 %v3926_v2, %s2262_s23 }
 0x179   : > { %907 = vrot.lane.b32.xlu0 %v3927_v39, %s2262_s23  ;;  %v3938_v39 = vld [vmem:[#allocation26_spill] sm:$0xff] }
 0x17a   : > { %v1458_v5 = vpop.permute.xlu1 %1457 }
 0x17b   : > { %1537 = vst.msk [vmem:[#allocation2 + $0x88] sm:$0xff] %vm1519_vm10, %v1458_v5  ;;  %v1426_v4 = vpop.permute.xlu0 %1425 }
 0x17c   : > { %1570 = vst.msk [vmem:[#allocation2 + $0x88] sm:$0xff] %vm1552_vm11, %v2267_v47  ;;  %1071 = vrot.lane.b32.xlu1 %v2896_v61, %s2263_s24 }
 0x17d   : > { %1521 = vst.msk [vmem:[#allocation2 + $0x8] sm:$0xff] %vm1519_vm10, %v1426_v4  ;;  %1039 = vrot.lane.b32.xlu0 %v3928_v35, %s2263_s24 }
 0x17e   : > { %1554 = vst.msk [vmem:[#allocation2 + $0x8] sm:$0xff] %vm1552_vm11, %v2267_v47  ;;  %v1062_v23 = vpop.permute.xlu1 %1061 }
 0x17f   : > { %1139 = vst.msk [vmem:[#allocation2 + $0x98] sm:$0xff] %vm1119_vm7, %v1062_v23  ;;  %v1030_v51 = vpop.permute.xlu0 %1029 }
 0x180   : > { %1123 = vst.msk [vmem:[#allocation2 + $0x18] sm:$0xff] %vm1119_vm7, %v1030_v51  ;;  %1469 = vrot.lane.b32.xlu1 %v2891_v52, %s2266_s27 }
 0x181   : > { %1437 = vrot.lane.b32.xlu0 %v3929_v44, %s2266_s27 }
 0x182   : > { %v1191_v43 = vpop.permute.xlu1 %1190 }
 0x183   : > { %1269 = vst.msk [vmem:[#allocation2 + $0x90] sm:$0xff] %vm1250_vm8, %v1191_v43  ;;  %v1159_v61 = vpop.permute.xlu0 %1158  ;;  %v3941_v43 = vld [vmem:[#allocation32_spill] sm:$0xff] }
 0x184   : > { %1253 = vst.msk [vmem:[#allocation2 + $0x10] sm:$0xff] %vm1250_vm8, %v1159_v61  ;;  %1073 = vrot.lane.b32.xlu1 %v2891_v52, %s2263_s24  ;;  %v1618_v61 = vld [vmem:[%s3811_s1 + $0x8] sm:$0xff] }
 0x185   : > { %1041 = vrot.lane.b32.xlu0 %v3929_v44, %s2263_s24 }
 0x186   : > { %v1193_v19 = vpop.permute.xlu1 %1192 }
 0x187   : > { %1270 = vst.msk [vmem:[#allocation2 + $0x98] sm:$0xff] %vm1250_vm8, %v1193_v19  ;;  %v1161_v50 = vpop.permute.xlu0 %1160 }
 0x188   : > { %1254 = vst.msk [vmem:[#allocation2 + $0x18] sm:$0xff] %vm1250_vm8, %v1161_v50  ;;  %1202 = vrot.lane.b32.xlu1 %v2521_v58, %s2264_s25  ;;  %v3931_v58 = vld [vmem:[#allocation12_spill] sm:$0xff] }
 0x189   : > { %1170 = vrot.lane.b32.xlu0 %v2408_v30, %s2264_s25  ;;  %v3930_v30 = vld [vmem:[#allocation25_spill] sm:$0xff] }
 0x18a   : > { %v1326_v49 = vpop.permute.xlu1 %1325 }
 0x18b   : > { %1404 = vst.msk [vmem:[#allocation2 + $0x90] sm:$0xff] %vm1385_vm9, %v1326_v49  ;;  %v1294_v26 = vpop.permute.xlu0 %1293 }
 0x18c   : > { %1388 = vst.msk [vmem:[#allocation2 + $0x10] sm:$0xff] %vm1385_vm9, %v1294_v26  ;;  %1204 = vrot.lane.b32.xlu1 %v2518_v57, %s2264_s25  ;;  %v1619_v26 = vld [vmem:[%s3811_s1 + $0x10] sm:$0xff] }
 0x18d   : > { %1172 = vrot.lane.b32.xlu0 %v2405_v29, %s2264_s25 }
 0x18e   : > { %v930_v52 = vpop.permute.xlu1 %929 }
 0x18f   : > { %1006 = vst.msk [vmem:[#allocation2 + $0xa0] sm:$0xff] %vm985_vm6, %v930_v52  ;;  %v898_v18 = vpop.permute.xlu0 %897  ;;  %v1620_v52 = vld [vmem:[%s3811_s1 + $0x18] sm:$0xff] }
 0x190   : > { %990 = vst.msk [vmem:[#allocation2 + $0x20] sm:$0xff] %vm985_vm6, %v898_v18  ;;  %1337 = vrot.lane.b32.xlu1 %v3930_v30, %s2265_s26 }
 0x191   : > { %1305 = vrot.lane.b32.xlu0 %v3931_v58, %s2265_s26 }
 0x192   : > { %v1328_v46 = vpop.permute.xlu1 %1327 }
 0x193   : > { %1405 = vst.msk [vmem:[#allocation2 + $0x98] sm:$0xff] %vm1385_vm9, %v1328_v46  ;;  %v1296_v11 = vpop.permute.xlu0 %1295  ;;  %v884_v46 = vrot.slane %v3026_v34, 1 }
 0x194   : > { %1389 = vst.msk [vmem:[#allocation2 + $0x18] sm:$0xff] %vm1385_vm9, %v1296_v11  ;;  %941 = vrot.lane.b32.xlu1 %v3930_v30, %s2262_s23  ;;  %v2157_v30 = vpack.c.bf16 %v1620_v52, %v1619_v26  ;;  %v1621_v11 = vld [vmem:[%s3811_s1 + $0x20] sm:$0xff] }
 0x195   : > { %909 = vrot.lane.b32.xlu0 %v3931_v58, %s2262_s23  ;;  %v885_v58 = vrot.slane %v3023_v3, 1 }
 0x196   : > { %v1460_v29 = vpop.permute.xlu1 %1459 }
 0x197   : > { %1538 = vst.msk [vmem:[#allocation2 + $0x90] sm:$0xff] %vm1519_vm10, %v1460_v29  ;;  %v1428_v57 = vpop.permute.xlu0 %1427  ;;  %v1622_v29 = vld [vmem:[%s3811_s1 + $0x28] sm:$0xff] }
 0x198   : > { %1571 = vst.msk [vmem:[#allocation2 + $0x90] sm:$0xff] %vm1552_vm11, %v2267_v47  ;;  %1339 = vrot.lane.b32.xlu1 %v3932_v10, %s2265_s26 }
 0x199   : > { %1522 = vst.msk [vmem:[#allocation2 + $0x10] sm:$0xff] %vm1519_vm10, %v1428_v57  ;;  %1307 = vrot.lane.b32.xlu0 %v3933_v16, %s2265_s26 }
 0x19a   : > { %1555 = vst.msk [vmem:[#allocation2 + $0x10] sm:$0xff] %vm1552_vm11, %v2267_v47  ;;  %v932_v45 = vpop.permute.xlu1 %931 }
 0x19b   : > { %1007 = vst.msk [vmem:[#allocation2 + $0xa8] sm:$0xff] %vm985_vm6, %v932_v45  ;;  %v900_v33 = vpop.permute.xlu0 %899  ;;  %v1623_v45 = vld [vmem:[%s3811_s1 + $0x30] sm:$0xff] }
 0x19c   : > { %991 = vst.msk [vmem:[#allocation2 + $0x28] sm:$0xff] %vm985_vm6, %v900_v33  ;;  %1471 = vrot.lane.b32.xlu1 %v2911_v54, %s2266_s27  ;;  %v1624_v33 = vld [vmem:[%s3811_s1 + $0x38] sm:$0xff] }
 0x19d   : > { %1439 = vrot.lane.b32.xlu0 %v3934_v14, %s2266_s27 }
 0x19e   : > { %v1064_v13 = vpop.permute.xlu1 %1063 }
 0x19f   : > { %1140 = vst.msk [vmem:[#allocation2 + $0xa0] sm:$0xff] %vm1119_vm7, %v1064_v13  ;;  %v1032_v8 = vpop.permute.xlu0 %1031  ;;  %v3482_v13 = vld [vmem:[%s2312_s19 + $0x190] sm:$0x3] }
 0x1a0   : > { %1124 = vst.msk [vmem:[#allocation2 + $0x20] sm:$0xff] %vm1119_vm7, %v1032_v8  ;;  %943 = vrot.lane.b32.xlu1 %v3932_v10, %s2262_s23  ;;  %v2161_v10 = vpack.c.bf16 %v1622_v29, %v1621_v11  ;;  %v2165_v8 = vpack.c.bf16 %v1624_v33, %v1623_v45  ;;  %v1603_v26 = vld [vmem:[#allocation2 + $0x90] sm:$0xff]  ;;  %v249_v45 = vld [vmem:[%s2312_s19 + $0x1a0] sm:$0xff] }
 0x1a1   : > { %911 = vrot.lane.b32.xlu0 %v3933_v16, %s2262_s23  ;;  %v1587_v52 = vld [vmem:[#allocation2 + $0x10] sm:$0xff] }
 0x1a2   : > { %v1462_v36 = vpop.permute.xlu1 %1461 }
 0x1a3   : > { %1539 = vst.msk [vmem:[#allocation2 + $0x98] sm:$0xff] %vm1519_vm10, %v1462_v36  ;;  %v1430_v20 = vpop.permute.xlu0 %1429  ;;  %v3942_v36 = vld [vmem:[#allocation16_spill] sm:$0xff] }
 0x1a4   : > { %1572 = vst.msk [vmem:[#allocation2 + $0x98] sm:$0xff] %vm1552_vm11, %v2267_v47  ;;  %1075 = vrot.lane.b32.xlu1 %v2911_v54, %s2263_s24 }
 0x1a5   : > { %1523 = vst.msk [vmem:[#allocation2 + $0x18] sm:$0xff] %vm1519_vm10, %v1430_v20  ;;  %1043 = vrot.lane.b32.xlu0 %v3934_v14, %s2263_s24  ;;  %v887_v20 = vrot.slane %v3482_v13, 1 }
 0x1a6   : > { %1556 = vst.msk [vmem:[#allocation2 + $0x18] sm:$0xff] %vm1552_vm11, %v2267_v47  ;;  %v1066_v21 = vpop.permute.xlu1 %1065 }
 0x1a7   : > { %1141 = vst.msk [vmem:[#allocation2 + $0xa8] sm:$0xff] %vm1119_vm7, %v1066_v21  ;;  %v1034_v38 = vpop.permute.xlu0 %1033  ;;  %v1625_v21 = vld [vmem:[%s3811_s1 + $0x40] sm:$0xff] }
 0x1a8   : > { %1125 = vst.msk [vmem:[#allocation2 + $0x28] sm:$0xff] %vm1119_vm7, %v1034_v38  ;;  %1473 = vrot.lane.b32.xlu1 %v2906_v22, %s2266_s27  ;;  %v1626_v38 = vld [vmem:[%s3811_s1 + $0x48] sm:$0xff] }
 0x1a9   : > { %1441 = vrot.lane.b32.xlu0 %v3935_v17, %s2266_s27 }
 0x1aa   : > { %v1195_v56 = vpop.permute.xlu1 %1194 }
 0x1ab   : > { %1271 = vst.msk [vmem:[#allocation2 + $0xa0] sm:$0xff] %vm1250_vm8, %v1195_v56  ;;  %v1163_v54 = vpop.permute.xlu0 %1162  ;;  %v2169_v56 = vpack.c.bf16 %v1626_v38, %v1625_v21  ;;  %v250_v38 = vld [vmem:[%s2312_s19 + $0x1a8] sm:$0x3] }
 0x1ac   : > { %1255 = vst.msk [vmem:[#allocation2 + $0x20] sm:$0xff] %vm1250_vm8, %v1163_v54  ;;  %1077 = vrot.lane.b32.xlu1 %v2906_v22, %s2263_s24 }
 0x1ad   : > { %1045 = vrot.lane.b32.xlu0 %v3935_v17, %s2263_s24 }
 0x1ae   : > { %v1197_v28 = vpop.permute.xlu1 %1196 }
 0x1af   : > { %1272 = vst.msk [vmem:[#allocation2 + $0xa8] sm:$0xff] %vm1250_vm8, %v1197_v28  ;;  %v1165_v0 = vpop.permute.xlu0 %1164  ;;  %v1019_v28 = vrot.slane %v3023_v3, 2 }
 0x1b0   : > { %1256 = vst.msk [vmem:[#allocation2 + $0x28] sm:$0xff] %vm1250_vm8, %v1165_v0  ;;  %1206 = vrot.lane.b32.xlu1 %v2536_v63, %s2264_s25  ;;  %v3937_v63 = vld [vmem:[#allocation14_spill] sm:$0xff]  ;;  %v1018_v0 = vrot.slane %v3026_v34, 2 }
 0x1b1   : > { %1174 = vrot.lane.b32.xlu0 %v2418_v32, %s2264_s25  ;;  %v3936_v32 = vld [vmem:[#allocation27_spill] sm:$0xff] }
 0x1b2   : > { %v1330_v1 = vpop.permute.xlu1 %1329 }
 0x1b3   : > { %1406 = vst.msk [vmem:[#allocation2 + $0xa0] sm:$0xff] %vm1385_vm9, %v1330_v1  ;;  %v1298_v59 = vpop.permute.xlu0 %1297  ;;  %v888_v1 = vsel %vm332_vm1, %v885_v58, %v887_v20  ;;  %v1285_v20 = vrot.slane %v249_v45, 1 }
 0x1b4   : > { %1390 = vst.msk [vmem:[#allocation2 + $0x20] sm:$0xff] %vm1385_vm9, %v1298_v59  ;;  %1208 = vrot.lane.b32.xlu1 %v2533_v62, %s2264_s25  ;;  %v1627_v59 = vld [vmem:[%s3811_s1 + $0x50] sm:$0xff] }
 0x1b5   : > { %1176 = vrot.lane.b32.xlu0 %v2415_v31, %s2264_s25 }
 0x1b6   : > { %v934_v22 = vpop.permute.xlu1 %933 }
 0x1b7   : > { %1008 = vst.msk [vmem:[#allocation2 + $0xb0] sm:$0xff] %vm985_vm6, %v934_v22  ;;  %v902_v24 = vpop.permute.xlu0 %901  ;;  %v1628_v22 = vld [vmem:[%s3811_s1 + $0x58] sm:$0xff] }
 0x1b8   : > { %992 = vst.msk [vmem:[#allocation2 + $0x30] sm:$0xff] %vm985_vm6, %v902_v24  ;;  %1341 = vrot.lane.b32.xlu1 %v3936_v32, %s2265_s26 }
 0x1b9   : > { %1309 = vrot.lane.b32.xlu0 %v3937_v63, %s2265_s26 }
 0x1ba   : > { %v1332_v55 = vpop.permute.xlu1 %1331 }
 0x1bb   : > { %1407 = vst.msk [vmem:[#allocation2 + $0xa8] sm:$0xff] %vm1385_vm9, %v1332_v55  ;;  %v1300_v2 = vpop.permute.xlu0 %1299  ;;  %v1020_v55 = vsel %vm542_vm2, %v1018_v0, %v1019_v28 }
 0x1bc   : > { %1391 = vst.msk [vmem:[#allocation2 + $0x28] sm:$0xff] %vm1385_vm9, %v1300_v2  ;;  %945 = vrot.lane.b32.xlu1 %v3936_v32, %s2262_s23  ;;  %v2173_v32 = vpack.c.bf16 %v1628_v22, %v1627_v59  ;;  %v1629_v2 = vld [vmem:[%s3811_s1 + $0x60] sm:$0xff] }
 0x1bd   : > { %913 = vrot.lane.b32.xlu0 %v3937_v63, %s2262_s23  ;;  %v3943_v63 = vld [vmem:[#allocation15_spill] sm:$0xff] }
 0x1be   : > { %v1464_v31 = vpop.permute.xlu1 %1463 }
 0x1bf   : > { %1540 = vst.msk [vmem:[#allocation2 + $0xa0] sm:$0xff] %vm1519_vm10, %v1464_v31  ;;  %v1432_v62 = vpop.permute.xlu0 %1431  ;;  %v1630_v31 = vld [vmem:[%s3811_s1 + $0x68] sm:$0xff] }
 0x1c0   : > { %1573 = vst.msk [vmem:[#allocation2 + $0xa0] sm:$0xff] %vm1552_vm11, %v2267_v47  ;;  %1343 = vrot.lane.b32.xlu1 %v3938_v39, %s2265_s26 }
 0x1c1   : > { %1524 = vst.msk [vmem:[#allocation2 + $0x20] sm:$0xff] %vm1519_vm10, %v1432_v62  ;;  %1311 = vrot.lane.b32.xlu0 %v3939_v25, %s2265_s26 }
 0x1c2   : > { %1557 = vst.msk [vmem:[#allocation2 + $0x20] sm:$0xff] %vm1552_vm11, %v2267_v47  ;;  %v936_v27 = vpop.permute.xlu1 %935 }
 0x1c3   : > { %1009 = vst.msk [vmem:[#allocation2 + $0xb8] sm:$0xff] %vm985_vm6, %v936_v27  ;;  %v904_v35 = vpop.permute.xlu0 %903  ;;  %v3944_v27 = vld [vmem:[#allocation35_spill] sm:$0xff] }
 0x1c4   : > { %993 = vst.msk [vmem:[#allocation2 + $0x38] sm:$0xff] %vm985_vm6, %v904_v35  ;;  %1475 = vrot.lane.b32.xlu1 %v2924_v48, %s2266_s27  ;;  %v1631_v35 = vld [vmem:[%s3811_s1 + $0x70] sm:$0xff] }
 0x1c5   : > { %1443 = vrot.lane.b32.xlu0 %v3940_v15, %s2266_s27 }
 0x1c6   : > { %v1068_v12 = vpop.permute.xlu1 %1067 }
 0x1c7   : > { %1142 = vst.msk [vmem:[#allocation2 + $0xb0] sm:$0xff] %vm1119_vm7, %v1068_v12  ;;  %v1036_v5 = vpop.permute.xlu0 %1035 }
 0x1c8   : > { %1126 = vst.msk [vmem:[#allocation2 + $0x30] sm:$0xff] %vm1119_vm7, %v1036_v5  ;;  %947 = vrot.lane.b32.xlu1 %v3938_v39, %s2262_s23  ;;  %v2177_v39 = vpack.c.bf16 %v1630_v31, %v1629_v2 }
 0x1c9   : > { %915 = vrot.lane.b32.xlu0 %v3939_v25, %s2262_s23  ;;  %v1589_v11 = vld [vmem:[#allocation2 + $0x20] sm:$0xff] }
 0x1ca   : > { %v1466_v4 = vpop.permute.xlu1 %1465 }
 0x1cb   : > { %1541 = vst.msk [vmem:[#allocation2 + $0xa8] sm:$0xff] %vm1519_vm10, %v1466_v4  ;;  %v1434_v23 = vpop.permute.xlu0 %1433 }
 0x1cc   : > { %1574 = vst.msk [vmem:[#allocation2 + $0xa8] sm:$0xff] %vm1552_vm11, %v2267_v47  ;;  %1079 = vrot.lane.b32.xlu1 %v2924_v48, %s2263_s24  ;;  %v1617_v48 = vld [vmem:[%s3811_s1] sm:$0xff] }
 0x1cd   : > { %1525 = vst.msk [vmem:[#allocation2 + $0x28] sm:$0xff] %vm1519_vm10, %v1434_v23  ;;  %1047 = vrot.lane.b32.xlu0 %v3940_v15, %s2263_s24  ;;  %v2153_v50 = vpack.c.bf16 %v1618_v61, %v1617_v48  ;;  %v1632_v15 = vld [vmem:[%s3811_s1 + $0x78] sm:$0xff]  ;;  %v1021_v23 = vrot.slane %v3482_v13, 2  ;;  %v1586_v61 = vld [vmem:[#allocation2 + $0x8] sm:$0xff] }
 0x1ce   : > { %1558 = vst.msk [vmem:[#allocation2 + $0x28] sm:$0xff] %vm1552_vm11, %v2267_v47  ;;  %v1070_v51 = vpop.permute.xlu1 %1069  ;;  %v2181_v5 = vpack.c.bf16 %v1632_v15, %v1631_v35 }
 0x1cf   : > { %1143 = vst.msk [vmem:[#allocation2 + $0xb8] sm:$0xff] %vm1119_vm7, %v1070_v51  ;;  %v1038_v44 = vpop.permute.xlu0 %1037  ;;  %2154 = vmatprep.subr.bf16.mxu0 %v2153_v50  ;;  %2185 = vmatprep.subr.bf16.mxu1 %v2153_v50 }
 0x1d0   : > { %1127 = vst.msk [vmem:[#allocation2 + $0x38] sm:$0xff] %vm1119_vm7, %v1038_v44  ;;  %1477 = vrot.lane.b32.xlu1 %v2921_v6, %s2266_s27  ;;  %2156 = vmatpush3.bf16.msra.mxu0 %v2153_v50  ;;  %v1601_v44 = vld [vmem:[#allocation2 + $0x80] sm:$0xff] }
 0x1d1   : > { %1445 = vrot.lane.b32.xlu0 %v3941_v43, %s2266_s27  ;;  %2193 = vmatpush3.bf16.msra.mxu1 %v2153_v50  ;;  %v1022_v50 = vsel %vm542_vm2, %v1019_v28, %v1021_v23 }
 0x1d2   : > { %v1199_v19 = vpop.permute.xlu1 %1198  ;;  %2158 = vmatprep.subr.bf16.mxu0 %v2157_v30  ;;  %2186 = vmatprep.subr.bf16.mxu1 %v2157_v30 }
 0x1d3   : > { %1273 = vst.msk [vmem:[#allocation2 + $0xb0] sm:$0xff] %vm1250_vm8, %v1199_v19  ;;  %v1167_v49 = vpop.permute.xlu0 %1166  ;;  %2129 = vmatprep.mubr.f32.mxu1 %v1601_v44  ;;  %v1602_v19 = vld [vmem:[#allocation2 + $0x88] sm:$0xff] }
 0x1d4   : > { %1257 = vst.msk [vmem:[#allocation2 + $0x30] sm:$0xff] %vm1250_vm8, %v1167_v49  ;;  %1081 = vrot.lane.b32.xlu1 %v2921_v6, %s2263_s24  ;;  %2160 = vmatpush3.bf16.msra.mxu0 %v2157_v30 }
 0x1d5   : > { %1049 = vrot.lane.b32.xlu0 %v3941_v43, %s2263_s24  ;;  %2194 = vmatpush3.bf16.msra.mxu1 %v2157_v30  ;;  %v1585_v43 = vld [vmem:[#allocation2] sm:$0xff]  ;;  %v1588_v30 = vld [vmem:[#allocation2 + $0x18] sm:$0xff] }
 0x1d6   : > { %v1201_v18 = vpop.permute.xlu1 %1200  ;;  %2162 = vmatprep.subr.bf16.mxu0 %v2161_v10  ;;  %2187 = vmatprep.subr.bf16.mxu1 %v2161_v10 }
 0x1d7   : > { %1274 = vst.msk [vmem:[#allocation2 + $0xb8] sm:$0xff] %vm1250_vm8, %v1201_v18  ;;  %v1169_v6 = vpop.permute.xlu0 %1168  ;;  %2105 = vmatprep.mubr.f32.mxu0 %v1585_v43 }
 0x1d8   : > { %1258 = vst.msk [vmem:[#allocation2 + $0x38] sm:$0xff] %vm1250_vm8, %v1169_v6  ;;  %1210 = vrot.lane.b32.xlu1 %v3026_v34, %s2264_s25  ;;  %2164 = vmatpush3.bf16.msra.mxu0 %v2161_v10  ;;  %v1604_v6 = vld [vmem:[#allocation2 + $0x98] sm:$0xff] }
 0x1d9   : > { %1178 = vrot.lane.b32.xlu0 %v2445_v40, %s2264_s25  ;;  %v886_v40 = vsel %vm332_vm1, %v884_v46, %v885_v58  ;;  %2195 = vmatpush3.bf16.msra.mxu1 %v2161_v10  ;;  %v1605_v46 = vld [vmem:[#allocation2 + $0xa0] sm:$0xff]  ;;  %v1606_v10 = vld [vmem:[#allocation2 + $0xa8] sm:$0xff] }
 0x1da   : > { %v1334_v57 = vpop.permute.xlu1 %1333  ;;  %2166 = vmatprep.subr.bf16.mxu0 %v2165_v8  ;;  %2188 = vmatprep.subr.bf16.mxu1 %v2165_v8 }
 0x1db   : > { %1408 = vst.msk [vmem:[#allocation2 + $0xb0] sm:$0xff] %vm1385_vm9, %v1334_v57  ;;  %v1302_v16 = vpop.permute.xlu0 %1301  ;;  %v1590_v57 = vld [vmem:[#allocation2 + $0x28] sm:$0xff] }
 0x1dc   : > { %1392 = vst.msk [vmem:[#allocation2 + $0x30] sm:$0xff] %vm1385_vm9, %v1302_v16  ;;  %1212 = vrot.lane.b32.xlu1 %v3023_v3, %s2264_s25  ;;  %2168 = vmatpush3.bf16.msra.mxu0 %v2165_v8  ;;  %v3945_v3 = vld [vmem:[#allocation34_spill] sm:$0xff] }
 0x1dd   : > { %1180 = vrot.lane.b32.xlu0 %v2434_v37, %s2264_s25  ;;  %2196 = vmatpush3.bf16.msra.mxu1 %v2165_v8  ;;  %v248_v16 = vld [vmem:[%s2312_s19 + $0x198] sm:$0xff] }
 0x1de   : > { %v938_v14 = vpop.permute.xlu1 %937  ;;  %2170 = vmatprep.subr.bf16.mxu0 %v2169_v56  ;;  %2189 = vmatprep.subr.bf16.mxu1 %v2169_v56  ;;  %v1418_v0 = vrot.slane %v248_v16, 2 }
 0x1df   : > { %1010 = vst.msk [vmem:[#allocation2 + $0xc0] sm:$0xff] %vm985_vm6, %v938_v14  ;;  %v906_v37 = vpop.permute.xlu0 %905 }
 0x1e0   : > { %994 = vst.msk [vmem:[#allocation2 + $0x40] sm:$0xff] %vm985_vm6, %v906_v37  ;;  %1345 = vrot.lane.b32.xlu1 %v886_v40, %s2265_s26  ;;  %2172 = vmatpush3.bf16.msra.mxu0 %v2169_v56 }
 0x1e1   : > { %1313 = vrot.lane.b32.xlu0 %v3942_v36, %s2265_s26  ;;  %2197 = vmatpush3.bf16.msra.mxu1 %v2169_v56 }
 0x1e2   : > { %v1336_v17 = vpop.permute.xlu1 %1335  ;;  %2174 = vmatprep.subr.bf16.mxu0 %v2173_v32  ;;  %2190 = vmatprep.subr.bf16.mxu1 %v2173_v32 }
 0x1e3   : > { %1409 = vst.msk [vmem:[#allocation2 + $0xb8] sm:$0xff] %vm1385_vm9, %v1336_v17  ;;  %v1304_v54 = vpop.permute.xlu0 %1303 }
 0x1e4   : > { %1393 = vst.msk [vmem:[#allocation2 + $0x38] sm:$0xff] %vm1385_vm9, %v1304_v54  ;;  %949 = vrot.lane.b32.xlu1 %v886_v40, %s2262_s23  ;;  %2176 = vmatpush3.bf16.msra.mxu0 %v2173_v32  ;;  %v1287_v54 = vrot.slane %v250_v38, 1 }
 0x1e5   : > { %917 = vrot.lane.b32.xlu0 %v3942_v36, %s2262_s23  ;;  %2198 = vmatpush3.bf16.msra.mxu1 %v2173_v32  ;;  %v1284_v36 = vrot.slane %v248_v16, 1  ;;  %v1421_v32 = vrot.slane %v250_v38, 2 }
 0x1e6   : > { %v1468_v24 = vpop.permute.xlu1 %1467  ;;  %2178 = vmatprep.subr.bf16.mxu0 %v2177_v39  ;;  %2191 = vmatprep.subr.bf16.mxu1 %v2177_v39  ;;  %v1288_v59 = vsel %vm332_vm1, %v1285_v20, %v1287_v54 }
 0x1e7   : > { %1542 = vst.msk [vmem:[#allocation2 + $0xb0] sm:$0xff] %vm1519_vm10, %v1468_v24  ;;  %v1436_v34 = vpop.permute.xlu0 %1435  ;;  %v1286_v56 = vsel %vm332_vm1, %v1284_v36, %v1285_v20 }
 0x1e8   : > { %1575 = vst.msk [vmem:[#allocation2 + $0xb0] sm:$0xff] %vm1552_vm11, %v2267_v47  ;;  %1347 = vrot.lane.b32.xlu1 %v888_v1, %s2265_s26  ;;  %2180 = vmatpush3.bf16.msra.mxu0 %v2177_v39 }
 0x1e9   : > { %1526 = vst.msk [vmem:[#allocation2 + $0x30] sm:$0xff] %vm1519_vm10, %v1436_v34  ;;  %1315 = vrot.lane.b32.xlu0 %v3943_v63, %s2265_s26  ;;  %2199 = vmatpush3.bf16.msra.mxu1 %v2177_v39 }
 0x1ea   : > { %1559 = vst.msk [vmem:[#allocation2 + $0x30] sm:$0xff] %vm1552_vm11, %v2267_v47  ;;  %v940_v62 = vpop.permute.xlu1 %939  ;;  %2182 = vmatprep.subr.bf16.mxu0 %v2181_v5  ;;  %2192 = vmatprep.subr.bf16.mxu1 %v2181_v5 }
 0x1eb   : > { %1011 = vst.msk [vmem:[#allocation2 + $0xc8] sm:$0xff] %vm985_vm6, %v940_v62  ;;  %v908_v25 = vpop.permute.xlu0 %907 }
 0x1ec   : > { %995 = vst.msk [vmem:[#allocation2 + $0x48] sm:$0xff] %vm985_vm6, %v908_v25  ;;  %1479 = vrot.lane.b32.xlu1 %v1020_v55, %s2266_s27  ;;  %2184 = vmatpush3.bf16.msra.mxu0 %v2181_v5 }
 0x1ed   : > { %1447 = vrot.lane.b32.xlu0 %v3944_v27, %s2266_s27  ;;  %2200 = vmatpush3.bf16.msra.mxu1 %v2181_v5 }
 0x1ee   : > { %v1072_v12 = vpop.permute.xlu1 %1071 }
 0x1ef   : > { %1144 = vst.msk [vmem:[#allocation2 + $0xc0] sm:$0xff] %vm1119_vm7, %v1072_v12  ;;  %v1040_v4 = vpop.permute.xlu0 %1039  ;;  %2106 = vmatmul.mubr.f32.vlgmr.msra.gmra.mrb[0].mxu0 %v1586_v61  ;;  %v1607_v33 = vld [vmem:[#allocation2 + $0xb0] sm:$0xff] }
 0x1f0   : > { %1128 = vst.msk [vmem:[#allocation2 + $0x40] sm:$0xff] %vm1119_vm7, %v1040_v4  ;;  %951 = vrot.lane.b32.xlu1 %v888_v1, %s2262_s23  ;;  %2130 = vmatmul.mubr.f32.vlgmr.msra.gmra.mrb[0].mxu1 %v1602_v19  ;;  %v1419_v1 = vrot.slane %v249_v45, 2 }
 0x1f1   : > { %919 = vrot.lane.b32.xlu0 %v3943_v63, %s2262_s23  ;;  %2132 = vmatprep.mubr.f32.mxu1 %v1603_v26  ;;  %v1591_v14 = vld [vmem:[#allocation2 + $0x30] sm:$0xff] }
 0x1f2   : > { %v1470_v51 = vpop.permute.xlu1 %1469  ;;  %2108 = vmatprep.mubr.f32.mxu0 %v1587_v52  ;;  %v1420_v24 = vsel %vm542_vm2, %v1418_v0, %v1419_v1 }
 0x1f3   : > { %1543 = vst.msk [vmem:[#allocation2 + $0xb8] sm:$0xff] %vm1519_vm10, %v1470_v51  ;;  %v1438_v48 = vpop.permute.xlu0 %1437  ;;  %2109 = vmatmul.mubr.f32.gmra.mrb[2].mxu0 %v1588_v30 }
 0x1f4   : > { %1576 = vst.msk [vmem:[#allocation2 + $0xb8] sm:$0xff] %vm1552_vm11, %v2267_v47  ;;  %1083 = vrot.lane.b32.xlu1 %v1020_v55, %s2263_s24  ;;  %2133 = vmatmul.mubr.f32.gmra.mrb[2].mxu1 %v1604_v6 }
 0x1f5   : > { %1527 = vst.msk [vmem:[#allocation2 + $0x38] sm:$0xff] %vm1519_vm10, %v1438_v48  ;;  %1051 = vrot.lane.b32.xlu0 %v3944_v27, %s2263_s24  ;;  %2135 = vmatprep.mubr.f32.mxu1 %v1605_v46 }
 0x1f6   : > { %1560 = vst.msk [vmem:[#allocation2 + $0x38] sm:$0xff] %vm1552_vm11, %v2267_v47  ;;  %v1074_v49 = vpop.permute.xlu1 %1073  ;;  %2111 = vmatprep.mubr.f32.mxu0 %v1589_v11 }
 0x1f7   : > { %1145 = vst.msk [vmem:[#allocation2 + $0xc8] sm:$0xff] %vm1119_vm7, %v1074_v49  ;;  %v1042_v18 = vpop.permute.xlu0 %1041  ;;  %2112 = vmatmul.mubr.f32.gmra.mrb[4].mxu0 %v1590_v57 }
 0x1f8   : > { %1129 = vst.msk [vmem:[#allocation2 + $0x48] sm:$0xff] %vm1119_vm7, %v1042_v18  ;;  %1481 = vrot.lane.b32.xlu1 %v1022_v50, %s2266_s27  ;;  %2136 = vmatmul.mubr.f32.gmra.mrb[4].mxu1 %v1606_v10 }
 0x1f9   : > { %1449 = vrot.lane.b32.xlu0 %v3945_v3, %s2266_s27  ;;  %2138 = vmatprep.mubr.f32.mxu1 %v1607_v33 }
 0x1fa   : > { %v1203_v58 = vpop.permute.xlu1 %1202  ;;  %2114 = vmatprep.mubr.f32.mxu0 %v1591_v14 }
 0x1fb   : > { %1275 = vst.msk [vmem:[#allocation2 + $0xc0] sm:$0xff] %vm1250_vm8, %v1203_v58  ;;  %v1171_v29 = vpop.permute.xlu0 %1170  ;;  %v1608_v37 = vld [vmem:[#allocation2 + $0xb8] sm:$0xff] }
 0x1fc   : > { %1259 = vst.msk [vmem:[#allocation2 + $0x40] sm:$0xff] %vm1250_vm8, %v1171_v29  ;;  %1085 = vrot.lane.b32.xlu1 %v1022_v50, %s2263_s24  ;;  %2139 = vmatmul.mubr.f32.gmra.mrb[6].mxu1 %v1608_v37 }
 0x1fd   : > { %1053 = vrot.lane.b32.xlu0 %v3945_v3, %s2263_s24  ;;  %v1592_v8 = vld [vmem:[#allocation2 + $0x38] sm:$0xff]  ;;  %s2024_s24 = sshll.u32 %s3951_s12, 8 }
 0x1fe   : > { %v1205_v40 = vpop.permute.xlu1 %1204  ;;  %2115 = vmatmul.mubr.f32.gmra.mrb[6].mxu0 %v1592_v8 }
 0x1ff   : > { %1276 = vst.msk [vmem:[#allocation2 + $0xc8] sm:$0xff] %vm1250_vm8, %v1205_v40  ;;  %v1173_v13 = vpop.permute.xlu0 %1172 }
 0x200   : > { %1260 = vst.msk [vmem:[#allocation2 + $0x48] sm:$0xff] %vm1250_vm8, %v1173_v13  ;;  %1214 = vrot.lane.b32.xlu1 %v248_v16, %s2264_s25 }
 0x201   : > { %1182 = vrot.lane.b32.xlu0 %v2451_v42, %s2264_s25 }
 0x202   : > { %v1338_v21 = vpop.permute.xlu1 %1337 }
 0x203   : > { %1410 = vst.msk [vmem:[#allocation2 + $0xc0] sm:$0xff] %vm1385_vm9, %v1338_v21  ;;  %v1306_v17 = vpop.permute.xlu0 %1305 }
 0x204   : > { %1394 = vst.msk [vmem:[#allocation2 + $0x40] sm:$0xff] %vm1385_vm9, %v1306_v17  ;;  %1216 = vrot.lane.b32.xlu1 %v249_v45, %s2264_s25 }
 0x205   : > { %1184 = vrot.lane.b32.xlu0 %v2448_v41, %s2264_s25 }
 0x206   : > { %v942_v28 = vpop.permute.xlu1 %941 }
 0x207   : > { %1012 = vst.msk [vmem:[#allocation2 + $0xd0] sm:$0xff] %vm985_vm6, %v942_v28  ;;  %v910_v42 = vpop.permute.xlu0 %909 }
 0x208   : > { %996 = vst.msk [vmem:[#allocation2 + $0x50] sm:$0xff] %vm985_vm6, %v910_v42  ;;  %1349 = vrot.lane.b32.xlu1 %v1286_v56, %s2265_s26 }
 0x209   : > { %1317 = vrot.lane.b32.xlu0 %v2627_v53, %s2265_s26 }
 0x20a   : > { %v1340_v22 = vpop.permute.xlu1 %1339 }
 0x20b   : > { %1411 = vst.msk [vmem:[#allocation2 + $0xc8] sm:$0xff] %vm1385_vm9, %v1340_v22  ;;  %v1308_v41 = vpop.permute.xlu0 %1307 }
 0x20c   : > { %1395 = vst.msk [vmem:[#allocation2 + $0x48] sm:$0xff] %vm1385_vm9, %v1308_v41  ;;  %1351 = vrot.lane.b32.xlu1 %v1288_v59, %s2265_s26 }
 0x20d   : > { %1319 = vrot.lane.b32.xlu0 %v2622_v60, %s2265_s26  ;;  %v1422_v60 = vsel %vm542_vm2, %v1419_v1, %v1421_v32 }
 0x20e   : > { %v1472_v34 = vpop.permute.xlu1 %1471 }
 0x20f   : > { %1544 = vst.msk [vmem:[#allocation2 + $0xc0] sm:$0xff] %vm1519_vm10, %v1472_v34  ;;  %v1440_v53 = vpop.permute.xlu0 %1439 }
 0x210   : > { %1577 = vst.msk [vmem:[#allocation2 + $0xc0] sm:$0xff] %vm1552_vm11, %v2267_v47  ;;  %1483 = vrot.lane.b32.xlu1 %v1420_v24, %s2266_s27 }
 0x211   : > { %1528 = vst.msk [vmem:[#allocation2 + $0x40] sm:$0xff] %vm1519_vm10, %v1440_v53  ;;  %1451 = vrot.lane.b32.xlu0 %v2844_v9, %s2266_s27 }
 0x212   : > { %1561 = vst.msk [vmem:[#allocation2 + $0x40] sm:$0xff] %vm1552_vm11, %v2267_v47  ;;  %v944_v63 = vpop.permute.xlu1 %943 }
 0x213   : > { %1013 = vst.msk [vmem:[#allocation2 + $0xd8] sm:$0xff] %vm985_vm6, %v944_v63  ;;  %v912_v55 = vpop.permute.xlu0 %911 }
 0x214   : > { %997 = vst.msk [vmem:[#allocation2 + $0x58] sm:$0xff] %vm985_vm6, %v912_v55  ;;  %1485 = vrot.lane.b32.xlu1 %v1422_v60, %s2266_s27 }
 0x215   : > { %1453 = vrot.lane.b32.xlu0 %v2839_v7, %s2266_s27  ;;  %s3704_s27 = scalar_lea.vmem %s3813_s3, %s2024_s24 }
 0x216   : > { %v1076_v2 = vpop.permute.xlu1 %1075 }
 0x217   : > { %1146 = vst.msk [vmem:[#allocation2 + $0xd0] sm:$0xff] %vm1119_vm7, %v1076_v2  ;;  %v1044_v31 = vpop.permute.xlu0 %1043  ;;  %v1609_v62 = vld [vmem:[#allocation2 + $0xc0] sm:$0xff] }
 0x218   : > { %1130 = vst.msk [vmem:[#allocation2 + $0x50] sm:$0xff] %vm1119_vm7, %v1044_v31  ;;  %2141 = vmatprep.mubr.f32.mxu1 %v1609_v62 }
 0x219   : > { %v1593_v9 = vld [vmem:[#allocation2 + $0x40] sm:$0xff] }
 0x21a   : > { %2117 = vmatprep.mubr.f32.mxu0 %v1593_v9  ;;  %v1474_v39 = vpop.permute.xlu1 %1473 }
 0x21b   : > { %1545 = vst.msk [vmem:[#allocation2 + $0xc8] sm:$0xff] %vm1519_vm10, %v1474_v39  ;;  %v1442_v25 = vpop.permute.xlu0 %1441 }
 0x21c   : > { %1578 = vst.msk [vmem:[#allocation2 + $0xc8] sm:$0xff] %vm1552_vm11, %v2267_v47 }
 0x21d   : > { %1529 = vst.msk [vmem:[#allocation2 + $0x48] sm:$0xff] %vm1519_vm10, %v1442_v25 }
 0x21e   : > { %1562 = vst.msk [vmem:[#allocation2 + $0x48] sm:$0xff] %vm1552_vm11, %v2267_v47  ;;  %v1078_v7 = vpop.permute.xlu1 %1077 }
 0x21f   : > { %1147 = vst.msk [vmem:[#allocation2 + $0xd8] sm:$0xff] %vm1119_vm7, %v1078_v7  ;;  %v1046_v27 = vpop.permute.xlu0 %1045 }
 0x220   : > { %1131 = vst.msk [vmem:[#allocation2 + $0x58] sm:$0xff] %vm1119_vm7, %v1046_v27 }
 0x222   : > { %v1207_v35 = vpop.permute.xlu1 %1206 }
 0x223   : > { %1277 = vst.msk [vmem:[#allocation2 + $0xd0] sm:$0xff] %vm1250_vm8, %v1207_v35  ;;  %v1175_v15 = vpop.permute.xlu0 %1174  ;;  %v1610_v12 = vld [vmem:[#allocation2 + $0xc8] sm:$0xff] }
 0x224   : > { %1261 = vst.msk [vmem:[#allocation2 + $0x50] sm:$0xff] %vm1250_vm8, %v1175_v15  ;;  %2142 = vmatmul.mubr.f32.gmra.mrb[8].mxu1 %v1610_v12 }
 0x225   : > { %v1594_v5 = vld [vmem:[#allocation2 + $0x48] sm:$0xff] }
 0x226   : > { %2118 = vmatmul.mubr.f32.gmra.mrb[8].mxu0 %v1594_v5  ;;  %v1209_v4 = vpop.permute.xlu1 %1208  ;;  %v3697_v5 = vld [vmem:[%s3812_s2] ss:$0 sm:$0xff] }
 0x227   : > { %1278 = vst.msk [vmem:[#allocation2 + $0xd8] sm:$0xff] %vm1250_vm8, %v1209_v4  ;;  %v1177_v23 = vpop.permute.xlu0 %1176 }
 0x228   : > { %1262 = vst.msk [vmem:[#allocation2 + $0x58] sm:$0xff] %vm1250_vm8, %v1177_v23 }
 0x22a   : > { %v1342_v51 = vpop.permute.xlu1 %1341 }
 0x22b   : > { %1412 = vst.msk [vmem:[#allocation2 + $0xd0] sm:$0xff] %vm1385_vm9, %v1342_v51  ;;  %v1310_v44 = vpop.permute.xlu0 %1309 }
 0x22c   : > { %1396 = vst.msk [vmem:[#allocation2 + $0x50] sm:$0xff] %vm1385_vm9, %v1310_v44 }
 0x22e   : > { %v946_v43 = vpop.permute.xlu1 %945 }
 0x22f   : > { %1014 = vst.msk [vmem:[#allocation2 + $0xe0] sm:$0xff] %vm985_vm6, %v946_v43  ;;  %v914_v48 = vpop.permute.xlu0 %913 }
 0x230   : > { %998 = vst.msk [vmem:[#allocation2 + $0x60] sm:$0xff] %vm985_vm6, %v914_v48 }
 0x232   : > { %v1344_v61 = vpop.permute.xlu1 %1343 }
 0x233   : > { %1413 = vst.msk [vmem:[#allocation2 + $0xd8] sm:$0xff] %vm1385_vm9, %v1344_v61  ;;  %v1312_v19 = vpop.permute.xlu0 %1311 }
 0x234   : > { %1397 = vst.msk [vmem:[#allocation2 + $0x58] sm:$0xff] %vm1385_vm9, %v1312_v19 }
 0x236   : > { %v1476_v50 = vpop.permute.xlu1 %1475 }
 0x237   : > { %1546 = vst.msk [vmem:[#allocation2 + $0xd0] sm:$0xff] %vm1519_vm10, %v1476_v50  ;;  %v1444_v49 = vpop.permute.xlu0 %1443 }
 0x238   : > { %1579 = vst.msk [vmem:[#allocation2 + $0xd0] sm:$0xff] %vm1552_vm11, %v2267_v47 }
 0x239   : > { %1530 = vst.msk [vmem:[#allocation2 + $0x50] sm:$0xff] %vm1519_vm10, %v1444_v49 }
 0x23a   : > { %1563 = vst.msk [vmem:[#allocation2 + $0x50] sm:$0xff] %vm1552_vm11, %v2267_v47  ;;  %v948_v26 = vpop.permute.xlu1 %947 }
 0x23b   : > { %1015 = vst.msk [vmem:[#allocation2 + $0xe8] sm:$0xff] %vm985_vm6, %v948_v26  ;;  %v916_v52 = vpop.permute.xlu0 %915 }
 0x23c   : > { %999 = vst.msk [vmem:[#allocation2 + $0x68] sm:$0xff] %vm985_vm6, %v916_v52 }
 0x23e   : > { %v1080_v18 = vpop.permute.xlu1 %1079 }
 0x23f   : > { %1148 = vst.msk [vmem:[#allocation2 + $0xe0] sm:$0xff] %vm1119_vm7, %v1080_v18  ;;  %v1048_v30 = vpop.permute.xlu0 %1047  ;;  %v1611_v6 = vld [vmem:[#allocation2 + $0xd0] sm:$0xff] }
 0x240   : > { %1132 = vst.msk [vmem:[#allocation2 + $0x60] sm:$0xff] %vm1119_vm7, %v1048_v30  ;;  %2144 = vmatprep.mubr.f32.mxu1 %v1611_v6 }
 0x241   : > { %v1595_v3 = vld [vmem:[#allocation2 + $0x50] sm:$0xff] }
 0x242   : > { %2120 = vmatprep.mubr.f32.mxu0 %v1595_v3  ;;  %v1478_v58 = vpop.permute.xlu1 %1477 }
 0x243   : > { %1547 = vst.msk [vmem:[#allocation2 + $0xd8] sm:$0xff] %vm1519_vm10, %v1478_v58  ;;  %v1446_v46 = vpop.permute.xlu0 %1445 }
 0x244   : > { %1580 = vst.msk [vmem:[#allocation2 + $0xd8] sm:$0xff] %vm1552_vm11, %v2267_v47 }
 0x245   : > { %1531 = vst.msk [vmem:[#allocation2 + $0x58] sm:$0xff] %vm1519_vm10, %v1446_v46 }
 0x246   : > { %1564 = vst.msk [vmem:[#allocation2 + $0x58] sm:$0xff] %vm1552_vm11, %v2267_v47  ;;  %v1082_v11 = vpop.permute.xlu1 %1081 }
 0x247   : > { %1149 = vst.msk [vmem:[#allocation2 + $0xe8] sm:$0xff] %vm1119_vm7, %v1082_v11  ;;  %v1050_v29 = vpop.permute.xlu0 %1049 }
 0x248   : > { %1133 = vst.msk [vmem:[#allocation2 + $0x68] sm:$0xff] %vm1119_vm7, %v1050_v29 }
 0x24a   : > { %v1211_v57 = vpop.permute.xlu1 %1210 }
 0x24b   : > { %1279 = vst.msk [vmem:[#allocation2 + $0xe0] sm:$0xff] %vm1250_vm8, %v1211_v57  ;;  %v1179_v10 = vpop.permute.xlu0 %1178  ;;  %v1612_v16 = vld [vmem:[#allocation2 + $0xd8] sm:$0xff] }
 0x24c   : > { %1263 = vst.msk [vmem:[#allocation2 + $0x60] sm:$0xff] %vm1250_vm8, %v1179_v10  ;;  %2145 = vmatmul.mubr.f32.gmra.mrb[10].mxu1 %v1612_v16 }
 0x24d   : > { %v1596_v40 = vld [vmem:[#allocation2 + $0x58] sm:$0xff] }
 0x24e   : > { %2121 = vmatmul.mubr.f32.gmra.mrb[10].mxu0 %v1596_v40  ;;  %v1213_v45 = vpop.permute.xlu1 %1212 }
 0x24f   : > { %1280 = vst.msk [vmem:[#allocation2 + $0xe8] sm:$0xff] %vm1250_vm8, %v1213_v45  ;;  %v1181_v33 = vpop.permute.xlu0 %1180 }
 0x250   : > { %1264 = vst.msk [vmem:[#allocation2 + $0x68] sm:$0xff] %vm1250_vm8, %v1181_v33 }
 0x252   : > { %v1346_v14 = vpop.permute.xlu1 %1345 }
 0x253   : > { %1414 = vst.msk [vmem:[#allocation2 + $0xe0] sm:$0xff] %vm1385_vm9, %v1346_v14  ;;  %v1314_v13 = vpop.permute.xlu0 %1313 }
 0x254   : > { %1398 = vst.msk [vmem:[#allocation2 + $0x60] sm:$0xff] %vm1385_vm9, %v1314_v13 }
 0x256   : > { %v950_v8 = vpop.permute.xlu1 %949 }
 0x257   : > { %1016 = vst.msk [vmem:[#allocation2 + $0xf0] sm:$0xff] %vm985_vm6, %v950_v8  ;;  %v918_v37 = vpop.permute.xlu0 %917 }
 0x258   : > { %1000 = vst.msk [vmem:[#allocation2 + $0x70] sm:$0xff] %vm985_vm6, %v918_v37 }
 0x25a   : > { %v1348_v36 = vpop.permute.xlu1 %1347 }
 0x25b   : > { %1415 = vst.msk [vmem:[#allocation2 + $0xe8] sm:$0xff] %vm1385_vm9, %v1348_v36  ;;  %v1316_v20 = vpop.permute.xlu0 %1315 }
 0x25c   : > { %1399 = vst.msk [vmem:[#allocation2 + $0x68] sm:$0xff] %vm1385_vm9, %v1316_v20 }
 0x25e   : > { %v1480_v21 = vpop.permute.xlu1 %1479 }
 0x25f   : > { %1548 = vst.msk [vmem:[#allocation2 + $0xe0] sm:$0xff] %vm1519_vm10, %v1480_v21  ;;  %v1448_v38 = vpop.permute.xlu0 %1447 }
 0x260   : > { %1581 = vst.msk [vmem:[#allocation2 + $0xe0] sm:$0xff] %vm1552_vm11, %v2267_v47 }
 0x261   : > { %1532 = vst.msk [vmem:[#allocation2 + $0x60] sm:$0xff] %vm1519_vm10, %v1448_v38 }
 0x262   : > { %1565 = vst.msk [vmem:[#allocation2 + $0x60] sm:$0xff] %vm1552_vm11, %v2267_v47  ;;  %v952_v17 = vpop.permute.xlu1 %951 }
 0x263   : > { %1017 = vst.msk [vmem:[#allocation2 + $0xf8] sm:$0xff] %vm985_vm6, %v952_v17  ;;  %v920_v56 = vpop.permute.xlu0 %919 }
 0x264   : > { %1001 = vst.msk [vmem:[#allocation2 + $0x78] sm:$0xff] %vm985_vm6, %v920_v56 }
 0x266   : > { %v1084_v54 = vpop.permute.xlu1 %1083 }
 0x267   : > { %1150 = vst.msk [vmem:[#allocation2 + $0xf0] sm:$0xff] %vm1119_vm7, %v1084_v54  ;;  %v1052_v28 = vpop.permute.xlu0 %1051  ;;  %v1613_v42 = vld [vmem:[#allocation2 + $0xe0] sm:$0xff] }
 0x268   : > { %1134 = vst.msk [vmem:[#allocation2 + $0x70] sm:$0xff] %vm1119_vm7, %v1052_v28  ;;  %2147 = vmatprep.mubr.f32.mxu1 %v1613_v42 }
 0x269   : > { %v1597_v0 = vld [vmem:[#allocation2 + $0x60] sm:$0xff] }
 0x26a   : > { %2123 = vmatprep.mubr.f32.mxu0 %v1597_v0  ;;  %v1482_v1 = vpop.permute.xlu1 %1481 }
 0x26b   : > { %1549 = vst.msk [vmem:[#allocation2 + $0xe8] sm:$0xff] %vm1519_vm10, %v1482_v1  ;;  %v1450_v59 = vpop.permute.xlu0 %1449 }
 0x26c   : > { %1582 = vst.msk [vmem:[#allocation2 + $0xe8] sm:$0xff] %vm1552_vm11, %v2267_v47 }
 0x26d   : > { %1533 = vst.msk [vmem:[#allocation2 + $0x68] sm:$0xff] %vm1519_vm10, %v1450_v59 }
 0x26e   : > { %1566 = vst.msk [vmem:[#allocation2 + $0x68] sm:$0xff] %vm1552_vm11, %v2267_v47  ;;  %v1086_v22 = vpop.permute.xlu1 %1085 }
 0x26f   : > { %1151 = vst.msk [vmem:[#allocation2 + $0xf8] sm:$0xff] %vm1119_vm7, %v1086_v22  ;;  %v1054_v41 = vpop.permute.xlu0 %1053 }
 0x270   : > { %1135 = vst.msk [vmem:[#allocation2 + $0x78] sm:$0xff] %vm1119_vm7, %v1054_v41 }
 0x272   : > { %v1215_v24 = vpop.permute.xlu1 %1214 }
 0x273   : > { %1281 = vst.msk [vmem:[#allocation2 + $0xf0] sm:$0xff] %vm1250_vm8, %v1215_v24  ;;  %v1183_v32 = vpop.permute.xlu0 %1182  ;;  %v1614_v34 = vld [vmem:[#allocation2 + $0xe8] sm:$0xff] }
 0x274   : > { %1265 = vst.msk [vmem:[#allocation2 + $0x70] sm:$0xff] %vm1250_vm8, %v1183_v32  ;;  %2148 = vmatmul.mubr.f32.gmra.mrb[12].mxu1 %v1614_v34 }
 0x275   : > { %v1598_v53 = vld [vmem:[#allocation2 + $0x68] sm:$0xff] }
 0x276   : > { %2124 = vmatmul.mubr.f32.gmra.mrb[12].mxu0 %v1598_v53  ;;  %v1217_v60 = vpop.permute.xlu1 %1216 }
 0x277   : > { %1282 = vst.msk [vmem:[#allocation2 + $0xf8] sm:$0xff] %vm1250_vm8, %v1217_v60  ;;  %v1185_v63 = vpop.permute.xlu0 %1184 }
 0x278   : > { %1266 = vst.msk [vmem:[#allocation2 + $0x78] sm:$0xff] %vm1250_vm8, %v1185_v63 }
 0x27a   : > { %v1350_v55 = vpop.permute.xlu1 %1349 }
 0x27b   : > { %1416 = vst.msk [vmem:[#allocation2 + $0xf0] sm:$0xff] %vm1385_vm9, %v1350_v55  ;;  %v1318_v2 = vpop.permute.xlu0 %1317 }
 0x27c   : > { %1400 = vst.msk [vmem:[#allocation2 + $0x70] sm:$0xff] %vm1385_vm9, %v1318_v2 }
 0x27e   : > { %v1352_v31 = vpop.permute.xlu1 %1351 }
 0x27f   : > { %1417 = vst.msk [vmem:[#allocation2 + $0xf8] sm:$0xff] %vm1385_vm9, %v1352_v31  ;;  %v1320_v62 = vpop.permute.xlu0 %1319 }
 0x280   : > { %1401 = vst.msk [vmem:[#allocation2 + $0x78] sm:$0xff] %vm1385_vm9, %v1320_v62 }
 0x282   : > { %v1484_v9 = vpop.permute.xlu1 %1483 }
 0x283   : > { %1550 = vst.msk [vmem:[#allocation2 + $0xf0] sm:$0xff] %vm1519_vm10, %v1484_v9  ;;  %v1452_v39 = vpop.permute.xlu0 %1451 }
 0x284   : > { %1583 = vst.msk [vmem:[#allocation2 + $0xf0] sm:$0xff] %vm1552_vm11, %v2267_v47 }
 0x285   : > { %1534 = vst.msk [vmem:[#allocation2 + $0x70] sm:$0xff] %vm1519_vm10, %v1452_v39 }
 0x286   : > { %1567 = vst.msk [vmem:[#allocation2 + $0x70] sm:$0xff] %vm1552_vm11, %v2267_v47  ;;  %v1486_v25 = vpop.permute.xlu1 %1485 }
 0x287   : > { %1551 = vst.msk [vmem:[#allocation2 + $0xf8] sm:$0xff] %vm1519_vm10, %v1486_v25  ;;  %v1454_v7 = vpop.permute.xlu0 %1453 }
 0x288   : > { %1584 = vst.msk [vmem:[#allocation2 + $0xf8] sm:$0xff] %vm1552_vm11, %v2267_v47 }
 0x289   : > { %1535 = vst.msk [vmem:[#allocation2 + $0x78] sm:$0xff] %vm1519_vm10, %v1454_v7 }
 0x28a   : > { %1568 = vst.msk [vmem:[#allocation2 + $0x78] sm:$0xff] %vm1552_vm11, %v2267_v47 }
 0x28b   : > { %v1615_v27 = vld [vmem:[#allocation2 + $0xf0] sm:$0xff] }
 0x28c   : > { %2150 = vmatprep.mubr.f32.mxu1 %v1615_v27 }
 0x28d   : > { %v1599_v35 = vld [vmem:[#allocation2 + $0x70] sm:$0xff] }
 0x28e   : > { %2126 = vmatprep.mubr.f32.mxu0 %v1599_v35 }
 0x28f   : > { %v1616_v15 = vld [vmem:[#allocation2 + $0xf8] sm:$0xff] }
 0x290   : > { %2151 = vmatmul.mubr.f32.gmra.mrb[14].mxu1 %v1616_v15 }
 0x291   : > { %v1600_v12 = vld [vmem:[#allocation2 + $0x78] sm:$0xff] }
 0x292   : > { %2127 = vmatmul.mubr.f32.gmra.mrb[14].mxu0 %v1600_v12 }
 0x2c2   : > { %v2107_v4 = vpop.f32.mrb[0].mxu0 }
 0x2c3   : > { %v1712_v23 = vadd.f32 %v2107_v4, %v3697_v5  ;;  %v2131_v51 = vpop.f32.mrb[0].mxu1  ;;  %v1706_v44 = vpop.f32.mrb[1].mxu0 }
 0x2c4   : > { %v1792_v47 = vadd.f32 %v2131_v51, %v3697_v5  ;;  %v1707_v43 = vadd.f32 %v3697_v5, %v1706_v44  ;;  %v1786_v48 = vpop.f32.mrb[1].mxu1 }
 0x2c5   : > { %v1866_v61 = vmax.f32 %v1712_v23, 0.0  ;;  %v1787_v19 = vadd.f32 %v3697_v5, %v1786_v48 }
 0x2c6   : > { %v1882_v50 = vmax.f32 %v1792_v47, 0.0  ;;  %v1865_v49 = vmax.f32 %v1707_v43, 0.0  ;;  %v2110_v26 = vpop.f32.mrb[2].mxu0 }
 0x2c7   : > { %1899 = vst.msk [vmem:[%s3704_s27 + $0x8] sm:$0xff] %vm1897_vm12, %v1866_v61  ;;  %v1881_v52 = vmax.f32 %v1787_v19, 0.0  ;;  %v1722_v18 = vadd.f32 %v2110_v26, %v3697_v5  ;;  %v2134_v30 = vpop.f32.mrb[2].mxu1  ;;  %v1716_v6 = vpop.f32.mrb[3].mxu0 }
 0x2c8   : > { %1915 = vst.msk [vmem:[%s3704_s27 + $0x88] sm:$0xff] %vm1897_vm12, %v1882_v50  ;;  %1898 = vst.msk [vmem:[%s3704_s27] sm:$0xff] %vm1897_vm12, %v1865_v49  ;;  %v1802_v3 = vadd.f32 %v2134_v30, %v3697_v5  ;;  %v1717_v58 = vadd.f32 %v3697_v5, %v1716_v6  ;;  %v1796_v46 = vpop.f32.mrb[3].mxu1 }
 0x2c9   : > { %1914 = vst.msk [vmem:[%s3704_s27 + $0x80] sm:$0xff] %vm1897_vm12, %v1881_v52  ;;  %v1868_v11 = vmax.f32 %v1722_v18, 0.0  ;;  %v1797_v29 = vadd.f32 %v3697_v5, %v1796_v46 }
 0x2ca   : > { %v1884_v57 = vmax.f32 %v1802_v3, 0.0  ;;  %v1867_v10 = vmax.f32 %v1717_v58, 0.0  ;;  %v2113_v16 = vpop.f32.mrb[4].mxu0 }
 0x2cb   : > { %1901 = vst.msk [vmem:[%s3704_s27 + $0x18] sm:$0xff] %vm1897_vm12, %v1868_v11  ;;  %v1883_v40 = vmax.f32 %v1797_v29, 0.0  ;;  %v1732_v45 = vadd.f32 %v2113_v16, %v3697_v5  ;;  %v2137_v33 = vpop.f32.mrb[4].mxu1  ;;  %v1726_v14 = vpop.f32.mrb[5].mxu0 }
 0x2cc   : > { %1917 = vst.msk [vmem:[%s3704_s27 + $0x98] sm:$0xff] %vm1897_vm12, %v1884_v57  ;;  %1900 = vst.msk [vmem:[%s3704_s27 + $0x10] sm:$0xff] %vm1897_vm12, %v1867_v10  ;;  %v1812_v13 = vadd.f32 %v2137_v33, %v3697_v5  ;;  %v1727_v8 = vadd.f32 %v3697_v5, %v1726_v14  ;;  %v1806_v37 = vpop.f32.mrb[5].mxu1 }
 0x2cd   : > { %1916 = vst.msk [vmem:[%s3704_s27 + $0x90] sm:$0xff] %vm1897_vm12, %v1883_v40  ;;  %v1870_v36 = vmax.f32 %v1732_v45, 0.0  ;;  %v1807_v20 = vadd.f32 %v3697_v5, %v1806_v37 }
 0x2ce   : > { %v1886_v21 = vmax.f32 %v1812_v13, 0.0  ;;  %v1869_v38 = vmax.f32 %v1727_v8, 0.0 }
 0x2cf   : > { %1903 = vst.msk [vmem:[%s3704_s27 + $0x28] sm:$0xff] %vm1897_vm12, %v1870_v36  ;;  %v1885_v56 = vmax.f32 %v1807_v20, 0.0  ;;  %v2140_v28 = vpop.f32.mrb[6].mxu1 }
 0x2d0   : > { %1919 = vst.msk [vmem:[%s3704_s27 + $0xa8] sm:$0xff] %vm1897_vm12, %v1886_v21  ;;  %1902 = vst.msk [vmem:[%s3704_s27 + $0x20] sm:$0xff] %vm1897_vm12, %v1869_v38  ;;  %v1822_v0 = vadd.f32 %v2140_v28, %v3697_v5  ;;  %v1816_v59 = vpop.f32.mrb[7].mxu1 }
 0x2d1   : > { %v2116_v17 = vpop.f32.mrb[6].mxu0  ;;  %1918 = vst.msk [vmem:[%s3704_s27 + $0xa0] sm:$0xff] %vm1897_vm12, %v1885_v56  ;;  %v1817_v41 = vadd.f32 %v3697_v5, %v1816_v59 }
 0x2d2   : > { %v1742_v54 = vadd.f32 %v2116_v17, %v3697_v5  ;;  %v1736_v42 = vpop.f32.mrb[7].mxu0  ;;  %v1888_v24 = vmax.f32 %v1822_v0, 0.0 }
 0x2d3   : > { %v1737_v1 = vadd.f32 %v3697_v5, %v1736_v42  ;;  %v1887_v34 = vmax.f32 %v1817_v41, 0.0 }
 0x2d4   : > { %v1872_v22 = vmax.f32 %v1742_v54, 0.0  ;;  %1921 = vst.msk [vmem:[%s3704_s27 + $0xb8] sm:$0xff] %vm1897_vm12, %v1888_v24 }
 0x2d5   : > { %v1871_v32 = vmax.f32 %v1737_v1, 0.0  ;;  %1920 = vst.msk [vmem:[%s3704_s27 + $0xb0] sm:$0xff] %vm1897_vm12, %v1887_v34 }
 0x2d6   : > { %1905 = vst.msk [vmem:[%s3704_s27 + $0x38] sm:$0xff] %vm1897_vm12, %v1872_v22 }
 0x2d7   : > { %1904 = vst.msk [vmem:[%s3704_s27 + $0x30] sm:$0xff] %vm1897_vm12, %v1871_v32 }
 0x2f7   : > { %v2143_v53 = vpop.f32.mrb[8].mxu1 }
 0x2f8   : > { %v1832_v63 = vadd.f32 %v2143_v53, %v3697_v5  ;;  %v1826_v55 = vpop.f32.mrb[9].mxu1 }
 0x2f9   : > { %v2119_v60 = vpop.f32.mrb[8].mxu0  ;;  %v1827_v62 = vadd.f32 %v3697_v5, %v1826_v55 }
 0x2fa   : > { %v1752_v2 = vadd.f32 %v2119_v60, %v3697_v5  ;;  %v1746_v31 = vpop.f32.mrb[9].mxu0  ;;  %v1890_v9 = vmax.f32 %v1832_v63, 0.0 }
 0x2fb   : > { %v1747_v39 = vadd.f32 %v3697_v5, %v1746_v31  ;;  %v1889_v7 = vmax.f32 %v1827_v62, 0.0 }
 0x2fc   : > { %v1874_v25 = vmax.f32 %v1752_v2, 0.0  ;;  %1923 = vst.msk [vmem:[%s3704_s27 + $0xc8] sm:$0xff] %vm1897_vm12, %v1890_v9 }
 0x2fd   : > { %v1873_v27 = vmax.f32 %v1747_v39, 0.0  ;;  %1922 = vst.msk [vmem:[%s3704_s27 + $0xc0] sm:$0xff] %vm1897_vm12, %v1889_v7 }
 0x2fe   : > { %1907 = vst.msk [vmem:[%s3704_s27 + $0x48] sm:$0xff] %vm1897_vm12, %v1874_v25 }
 0x2ff   : > { %1906 = vst.msk [vmem:[%s3704_s27 + $0x40] sm:$0xff] %vm1897_vm12, %v1873_v27 }
 0x31f   : > { %v2146_v35 = vpop.f32.mrb[10].mxu1 }
 0x320   : > { %v1842_v12 = vadd.f32 %v2146_v35, %v3697_v5  ;;  %v1836_v4 = vpop.f32.mrb[11].mxu1 }
 0x321   : > { %v2122_v15 = vpop.f32.mrb[10].mxu0  ;;  %v1837_v44 = vadd.f32 %v3697_v5, %v1836_v4 }
 0x322   : > { %v1762_v23 = vadd.f32 %v2122_v15, %v3697_v5  ;;  %v1756_v51 = vpop.f32.mrb[11].mxu0  ;;  %v1892_v47 = vmax.f32 %v1842_v12, 0.0 }
 0x323   : > { %v1757_v43 = vadd.f32 %v3697_v5, %v1756_v51  ;;  %v1891_v61 = vmax.f32 %v1837_v44, 0.0 }
 0x324   : > { %v1876_v48 = vmax.f32 %v1762_v23, 0.0  ;;  %1925 = vst.msk [vmem:[%s3704_s27 + $0xd8] sm:$0xff] %vm1897_vm12, %v1892_v47 }
 0x325   : > { %v1875_v19 = vmax.f32 %v1757_v43, 0.0  ;;  %1924 = vst.msk [vmem:[%s3704_s27 + $0xd0] sm:$0xff] %vm1897_vm12, %v1891_v61 }
 0x326   : > { %1909 = vst.msk [vmem:[%s3704_s27 + $0x58] sm:$0xff] %vm1897_vm12, %v1876_v48 }
 0x327   : > { %1908 = vst.msk [vmem:[%s3704_s27 + $0x50] sm:$0xff] %vm1897_vm12, %v1875_v19 }
 0x347   : > { %v2149_v50 = vpop.f32.mrb[12].mxu1 }
 0x348   : > { %v1852_v26 = vadd.f32 %v2149_v50, %v3697_v5  ;;  %v1846_v52 = vpop.f32.mrb[13].mxu1 }
 0x349   : > { %v2125_v49 = vpop.f32.mrb[12].mxu0  ;;  %v1847_v6 = vadd.f32 %v3697_v5, %v1846_v52 }
 0x34a   : > { %v1772_v18 = vadd.f32 %v2125_v49, %v3697_v5  ;;  %v1766_v30 = vpop.f32.mrb[13].mxu0  ;;  %v1894_v3 = vmax.f32 %v1852_v26, 0.0 }
 0x34b   : > { %v1767_v58 = vadd.f32 %v3697_v5, %v1766_v30  ;;  %v1893_v11 = vmax.f32 %v1847_v6, 0.0 }
 0x34c   : > { %v1878_v46 = vmax.f32 %v1772_v18, 0.0  ;;  %1927 = vst.msk [vmem:[%s3704_s27 + $0xe8] sm:$0xff] %vm1897_vm12, %v1894_v3 }
 0x34d   : > { %v1877_v29 = vmax.f32 %v1767_v58, 0.0  ;;  %1926 = vst.msk [vmem:[%s3704_s27 + $0xe0] sm:$0xff] %vm1897_vm12, %v1893_v11 }
 0x34e   : > { %1911 = vst.msk [vmem:[%s3704_s27 + $0x68] sm:$0xff] %vm1897_vm12, %v1878_v46 }
 0x34f   : > { %1910 = vst.msk [vmem:[%s3704_s27 + $0x60] sm:$0xff] %vm1897_vm12, %v1877_v29 }
 0x363   : > { %v2152_v57 = vpop.f32.mrb[14].mxu1 }
 0x364   : > { %v1862_v16 = vadd.f32 %v2152_v57, %v3697_v5  ;;  %v1856_v40 = vpop.f32.mrb[15].mxu1 }
 0x365   : > { %v2128_v10 = vpop.f32.mrb[14].mxu0  ;;  %v1857_v14 = vadd.f32 %v3697_v5, %v1856_v40 }
 0x366   : > { %v1782_v45 = vadd.f32 %v2128_v10, %v3697_v5  ;;  %v1776_v33 = vpop.f32.mrb[15].mxu0  ;;  %v1896_v13 = vmax.f32 %v1862_v16, 0.0 }
 0x367   : > { %v1777_v8 = vadd.f32 %v3697_v5, %v1776_v33  ;;  %v1895_v36 = vmax.f32 %v1857_v14, 0.0 }
 0x368   : > { %v1880_v37 = vmax.f32 %v1782_v45, 0.0  ;;  %1929 = vst.msk [vmem:[%s3704_s27 + $0xf8] sm:$0xff] %vm1897_vm12, %v1896_v13 }
 0x369   : > { %v1879_v20 = vmax.f32 %v1777_v8, 0.0  ;;  %1928 = vst.msk [vmem:[%s3704_s27 + $0xf0] sm:$0xff] %vm1897_vm12, %v1895_v36 }
 0x36a   : > { %1913 = vst.msk [vmem:[%s3704_s27 + $0x78] sm:$0xff] %vm1897_vm12, %v1880_v37 }
 0x36b   : > { %1912 = vst.msk [vmem:[%s3704_s27 + $0x70] sm:$0xff] %vm1897_vm12, %v1879_v20 }
 0x36c PF: > { %s13_s14 = sadd.s32 1, %s2257_s14   ;;  %s3946_s12 = smov %s2253_s13 }
 0x36d   : > { %p10_p5 = scmp.ge.s32.totalorder %s13_s14, 4   ;;  %s3947_s13 = smov %s3949_s15 }
 0x36f   :  { %12 = sbr.rel (!%p10_p5) target bundleno = 2 (0x2), region = 63 }

</bundles_post_ra>
